<compile_context>
chip_gen: v7x
topology: tpu7x:2x2x1
jax: 0.10.0
libtpu: 0.0.40
codegen_flags: <defaults>
</compile_context>

<pallas_src>
import numpy as np
import jax
import jax.numpy as jnp
from jax.experimental import pallas as pl
from jax.experimental.pallas import tpu as pltpu

WEIGHTS = [1.0, 1.0, 1.0, 2.0, 1.0, 3.0]


def _sobel_kernels(size=5):
    h_range = np.arange(-size // 2 + 1, size // 2 + 1, dtype=np.float32)
    v_range = np.arange(-size // 2 + 1, size // 2 + 1, dtype=np.float32)
    h, v = np.meshgrid(h_range, v_range)
    kernel_h = h / (h * h + v * v + 1e-15)
    kernel_v = v / (h * h + v * v + 1e-15)
    return kernel_h.astype(np.float32), kernel_v.astype(np.float32)


HK, VK = _sobel_kernels(5)  # deterministic "weights" implied by get_gradient()


def _bce_map(pred, gt):
    # elementwise F.binary_cross_entropy term (log clamped at -100 like PyTorch)
    logp = jnp.maximum(jnp.log(pred), -100.0)
    log1 = jnp.maximum(jnp.log(1.0 - pred), -100.0)
    return -(gt * logp + (1.0 - gt) * log1)


def _loss_kernel(preds_ref, gts_ref, o_ref, dh_pad_ref, dv_pad_ref):
    # preds_ref / gts_ref: (4, H, W) one image, channels de-interleaved (lane = W)
    # o_ref: (8, W) per-image partial sums (rows reduced, lanes kept dense)
    # dh_pad_ref / dv_pad_ref: (H+4, W+4) f32 scratch: zero-padded HV diff maps
    _, H, W = preds_ref.shape

    pred_seg = preds_ref[0].astype(jnp.float32)
    pred_h = preds_ref[1].astype(jnp.float32)
    pred_v = preds_ref[2].astype(jnp.float32)
    pred_dot = preds_ref[3].astype(jnp.float32)
    gt_seg = gts_ref[0].astype(jnp.float32)
    gt_h = gts_ref[1].astype(jnp.float32)
    gt_v = gts_ref[2].astype(jnp.float32)
    gt_dot = gts_ref[3].astype(jnp.float32)

    # --- BCE terms (per-pixel maps) ---
    bce_m = _bce_map(pred_seg, gt_seg)
    mbce1_m = _bce_map(pred_dot * gt_dot, gt_dot)   # keep as-is: clamp semantics
    mbce2_m = _bce_map(pred_dot, gt_dot)

    # --- dice partial sums ---
    dice_n_m = pred_seg * gt_seg
    dice_d_m = pred_seg + gt_seg

    # --- HV difference & MSE map ---
    diff_h = pred_h - gt_h
    diff_v = pred_v - gt_v
    mse_m = diff_h * diff_h + diff_v * diff_v

    # --- Sobel gradient of the difference (conv(p) - conv(g) == conv(p - g)) ---
    # Zero the padded scratch every step (safe under megacore grid splits),
    # then write the interior; borders stay zero (= F.conv2d padding=2).
    dh_pad_ref[...] = jnp.zeros_like(dh_pad_ref)
    dv_pad_ref[...] = jnp.zeros_like(dv_pad_ref)
    dh_pad_ref[2:2 + H, 2:2 + W] = diff_h
    dv_pad_ref[2:2 + H, 2:2 + W] = diff_v

    grad_h = jnp.zeros((H, W), jnp.float32)
    grad_v = jnp.zeros((H, W), jnp.float32)
    for i in range(5):
        row_h = dh_pad_ref[i:i + H, :]    # (H, W+4) row slab, loaded once per i
        row_v = dv_pad_ref[i:i + H, :]
        for j in range(5):
            kh = float(HK[i, j])
            kv = float(VK[i, j])
            if kh != 0.0:
                grad_h = grad_h + kh * row_h[:, j:j + W]
            if kv != 0.0:
                grad_v = grad_v + kv * row_v[:, j:j + W]
    msge_m = grad_h * grad_h + grad_v * grad_v

    # --- dot-distance loss (pred dot thresholded at 0.5, gt dot not) ---
    pred_mask = (pred_dot >= 0.5).astype(jnp.float32)
    dd_h = pred_mask * pred_h - gt_dot * gt_h
    dd_v = pred_mask * pred_v - gt_dot * gt_v
    ddmse_m = dd_h * dd_h + dd_v * dd_v

    # --- per-image partial sums: reduce rows (sublanes) only, keep W lanes ---
    o_ref[0:1, :] = jnp.sum(bce_m, axis=0, keepdims=True)
    o_ref[1:2, :] = jnp.sum(mbce1_m, axis=0, keepdims=True)
    o_ref[2:3, :] = jnp.sum(mbce2_m, axis=0, keepdims=True)
    o_ref[3:4, :] = jnp.sum(dice_n_m, axis=0, keepdims=True)
    o_ref[4:5, :] = jnp.sum(dice_d_m, axis=0, keepdims=True)
    o_ref[5:6, :] = jnp.sum(mse_m, axis=0, keepdims=True)
    o_ref[6:7, :] = jnp.sum(msge_m, axis=0, keepdims=True)
    o_ref[7:8, :] = jnp.sum(ddmse_m, axis=0, keepdims=True)


@jax.jit
def custom_loss(preds, gts):
    """CustomLoss forward. preds/gts: (B, H, W, C>=4), any float dtype.
    Returns (scalar loss, (loss, bce, mbce, dice, mse, msge, ddmse))."""
    B, H, W = preds.shape[0], preds.shape[1], preds.shape[2]

    # De-interleave channels so W sits on the lane axis; keep native dtype
    # (e.g. bf16 inputs are DMA'd as bf16 and upcast per-tile inside the kernel).
    preds_t = jnp.transpose(preds[..., :4], (0, 3, 1, 2))   # (B, 4, H, W)
    gts_t = jnp.transpose(gts[..., :4], (0, 3, 1, 2))

    parts = pl.pallas_call(
        _loss_kernel,
        out_shape=jax.ShapeDtypeStruct((B, 8, W), jnp.float32),
        grid_spec=pltpu.PrefetchScalarGridSpec(
            num_scalar_prefetch=0,
            grid=(B,),
            in_specs=[
                pl.BlockSpec((None, 4, H, W), lambda b: (b, 0, 0, 0)),
                pl.BlockSpec((None, 4, H, W), lambda b: (b, 0, 0, 0)),
            ],
            out_specs=pl.BlockSpec((None, 8, W), lambda b: (b, 0, 0)),
            scratch_shapes=[
                pltpu.VMEM((H + 4, W + 4), jnp.float32),
                pltpu.VMEM((H + 4, W + 4), jnp.float32),
            ],
        ),
        compiler_params=pltpu.CompilerParams(
            dimension_semantics=("parallel",)),
    )(preds_t, gts_t)

    # Final tiny reduction + weight combine in plain JAX (keeps the grid parallel).
    s = jnp.sum(parts, axis=(0, 2))           # (8,)
    n = float(B * H * W)
    eps = 0.001
    bce = s[0] / n
    mbce = 3.0 * s[1] / n + s[2] / n
    dice = 1.0 - (2.0 * s[3] + eps) / (s[4] + eps)
    mse = s[5] / (2.0 * n)
    msge = s[6] / (2.0 * n)
    ddmse = s[7] / (2.0 * n)
    loss = (bce * WEIGHTS[0] + mbce * WEIGHTS[1] + dice * WEIGHTS[2]
            + mse * WEIGHTS[3] + msge * WEIGHTS[4] + ddmse * WEIGHTS[5])
    return loss, (loss, bce, mbce, dice, mse, msge, ddmse)


# ---------------------------------------------------------------------------
# Pure-numpy reference (mirrors the PyTorch module) for a correctness check.
# ---------------------------------------------------------------------------
def _np_bce(p, g):
    logp = np.maximum(np.log(p), -100.0)
    log1 = np.maximum(np.log(1.0 - p), -100.0)
    return -np.mean(g * logp + (1.0 - g) * log1)


def _np_sobel(hv):
    B, H, W, _ = hv.shape
    pad = np.pad(hv, ((0, 0), (2, 2), (2, 2), (0, 0)))
    dh = np.zeros((B, H, W), np.float64)
    dv = np.zeros((B, H, W), np.float64)
    for i in range(5):
        for j in range(5):
            dh += HK[i, j] * pad[:, i:i + H, j:j + W, 0]
            dv += VK[i, j] * pad[:, i:i + H, j:j + W, 1]
    return dh, dv


def reference_loss(preds, gts):
    preds = preds.astype(np.float64)
    gts = gts.astype(np.float64)
    ps, phv, pd = preds[..., 0:1], preds[..., 1:3], preds[..., 3:4]
    gs, ghv, gd = gts[..., 0:1], gts[..., 1:3], gts[..., 3:4]
    bce = _np_bce(ps, gs)
    mbce = _np_bce(pd * gd, gd) * 3.0 + _np_bce(pd, gd)
    eps = 0.001
    dice = 1.0 - (2.0 * np.sum(ps * gs) + eps) / (np.sum(ps + gs) + eps)
    mse = np.mean((phv - ghv) ** 2)
    pdh, pdv = _np_sobel(phv)
    gdh, gdv = _np_sobel(ghv)
    msge = np.mean(np.concatenate(
        [(pdh - gdh)[..., None] ** 2, (pdv - gdv)[..., None] ** 2], axis=-1))
    ddmse = np.mean(((pd >= 0.5).astype(np.float64) * phv - gd * ghv) ** 2)
    return (bce * WEIGHTS[0] + mbce * WEIGHTS[1] + dice * WEIGHTS[2]
            + mse * WEIGHTS[3] + msge * WEIGHTS[4] + ddmse * WEIGHTS[5])


if __name__ == "__main__":
    key = jax.random.PRNGKey(0)
    k1, k2 = jax.random.split(key)
    B, H, W, C = 2, 16, 16, 4
    # probabilities in (0,1) for seg/dot channels; HV channels also drawn uniform
    preds = jax.random.uniform(k1, (B, H, W, C), jnp.float32, 0.05, 0.95)
    gts = jax.random.uniform(k2, (B, H, W, C), jnp.float32, 0.05, 0.95)

    loss, all_losses = custom_loss(preds, gts)
    jax.block_until_ready(loss)

    ref = reference_loss(np.asarray(preds), np.asarray(gts))
    got = float(loss)
    assert np.isfinite(got), got
    assert abs(got - ref) <= max(1e-4, 5e-3 * abs(ref)), (got, ref)
    print("KERNEL_OK")
</pallas_src>

<mosaic_0001>
module attributes {stable_mosaic.version = 11 : i64} {
  func.func @_loss_kernel(%arg0: i32, %arg1: memref<1x4x16x16xf32, #tpu.memory_space<vmem>>, %arg2: memref<1x4x16x16xf32, #tpu.memory_space<vmem>>, %arg3: memref<1x8x16xf32, #tpu.memory_space<vmem>>, %arg4: memref<20x20xf32, #tpu.memory_space<vmem>>, %arg5: memref<20x20xf32, #tpu.memory_space<vmem>>) attributes {dimension_semantics = [#tpu.dimension_semantics<parallel>], iteration_bounds = array<i64: 2>, scalar_prefetch = 0 : i64, scratch_operands = 2 : i64, tpu.core_type = #tpu.core_type<tc>, window_params = [{transform_indices = @transform_0, window_bounds = array<i64: 1, 4, 16, 16>}, {transform_indices = @transform_1, window_bounds = array<i64: 1, 4, 16, 16>}, {transform_indices = @transform_2, window_bounds = array<i64: 1, 8, 16>}]} {
    %c0 = arith.constant 0 : index
    %c0_0 = arith.constant 0 : index
    %c0_1 = arith.constant 0 : index
    %c0_2 = arith.constant 0 : index
    %0 = vector.load %arg1[%c0, %c0_0, %c0_1, %c0_2] : memref<1x4x16x16xf32, #tpu.memory_space<vmem>>, vector<1x1x16x16xf32>
    %1 = vector.shape_cast %0 : vector<1x1x16x16xf32> to vector<16x16xf32>
    %c0_3 = arith.constant 0 : index
    %c1 = arith.constant 1 : index
    %c0_4 = arith.constant 0 : index
    %c0_5 = arith.constant 0 : index
    %2 = vector.load %arg1[%c0_3, %c1, %c0_4, %c0_5] : memref<1x4x16x16xf32, #tpu.memory_space<vmem>>, vector<1x1x16x16xf32>
    %3 = vector.shape_cast %2 : vector<1x1x16x16xf32> to vector<16x16xf32>
    %c0_6 = arith.constant 0 : index
    %c2 = arith.constant 2 : index
    %c0_7 = arith.constant 0 : index
    %c0_8 = arith.constant 0 : index
    %4 = vector.load %arg1[%c0_6, %c2, %c0_7, %c0_8] : memref<1x4x16x16xf32, #tpu.memory_space<vmem>>, vector<1x1x16x16xf32>
    %5 = vector.shape_cast %4 : vector<1x1x16x16xf32> to vector<16x16xf32>
    %c0_9 = arith.constant 0 : index
    %c3 = arith.constant 3 : index
    %c0_10 = arith.constant 0 : index
    %c0_11 = arith.constant 0 : index
    %6 = vector.load %arg1[%c0_9, %c3, %c0_10, %c0_11] : memref<1x4x16x16xf32, #tpu.memory_space<vmem>>, vector<1x1x16x16xf32>
    %7 = vector.shape_cast %6 : vector<1x1x16x16xf32> to vector<16x16xf32>
    %c0_12 = arith.constant 0 : index
    %c0_13 = arith.constant 0 : index
    %c0_14 = arith.constant 0 : index
    %c0_15 = arith.constant 0 : index
    %8 = vector.load %arg2[%c0_12, %c0_13, %c0_14, %c0_15] : memref<1x4x16x16xf32, #tpu.memory_space<vmem>>, vector<1x1x16x16xf32>
    %9 = vector.shape_cast %8 : vector<1x1x16x16xf32> to vector<16x16xf32>
    %c0_16 = arith.constant 0 : index
    %c1_17 = arith.constant 1 : index
    %c0_18 = arith.constant 0 : index
    %c0_19 = arith.constant 0 : index
    %10 = vector.load %arg2[%c0_16, %c1_17, %c0_18, %c0_19] : memref<1x4x16x16xf32, #tpu.memory_space<vmem>>, vector<1x1x16x16xf32>
    %11 = vector.shape_cast %10 : vector<1x1x16x16xf32> to vector<16x16xf32>
    %c0_20 = arith.constant 0 : index
    %c2_21 = arith.constant 2 : index
    %c0_22 = arith.constant 0 : index
    %c0_23 = arith.constant 0 : index
    %12 = vector.load %arg2[%c0_20, %c2_21, %c0_22, %c0_23] : memref<1x4x16x16xf32, #tpu.memory_space<vmem>>, vector<1x1x16x16xf32>
    %13 = vector.shape_cast %12 : vector<1x1x16x16xf32> to vector<16x16xf32>
    %c0_24 = arith.constant 0 : index
    %c3_25 = arith.constant 3 : index
    %c0_26 = arith.constant 0 : index
    %c0_27 = arith.constant 0 : index
    %14 = vector.load %arg2[%c0_24, %c3_25, %c0_26, %c0_27] : memref<1x4x16x16xf32, #tpu.memory_space<vmem>>, vector<1x1x16x16xf32>
    %15 = vector.shape_cast %14 : vector<1x1x16x16xf32> to vector<16x16xf32>
    %16 = math.log %1 : vector<16x16xf32>
    %cst = arith.constant -1.000000e+02 : f32
    %17 = vector.broadcast %cst : f32 to vector<16x16xf32>
    %18 = arith.maximumf %16, %17 : vector<16x16xf32>
    %cst_28 = arith.constant 1.000000e+00 : f32
    %19 = vector.broadcast %cst_28 : f32 to vector<16x16xf32>
    %20 = arith.subf %19, %1 : vector<16x16xf32>
    %21 = math.log %20 : vector<16x16xf32>
    %cst_29 = arith.constant -1.000000e+02 : f32
    %22 = vector.broadcast %cst_29 : f32 to vector<16x16xf32>
    %23 = arith.maximumf %21, %22 : vector<16x16xf32>
    %24 = arith.mulf %9, %18 : vector<16x16xf32>
    %cst_30 = arith.constant 1.000000e+00 : f32
    %25 = vector.broadcast %cst_30 : f32 to vector<16x16xf32>
    %26 = arith.subf %25, %9 : vector<16x16xf32>
    %27 = arith.mulf %26, %23 : vector<16x16xf32>
    %28 = arith.addf %24, %27 : vector<16x16xf32>
    %cst_31 = arith.constant 0.000000e+00 : f32
    %29 = vector.broadcast %cst_31 : f32 to vector<16x16xf32>
    %30 = arith.subf %29, %28 : vector<16x16xf32>
    %31 = arith.mulf %7, %15 : vector<16x16xf32>
    %32 = math.log %31 : vector<16x16xf32>
    %cst_32 = arith.constant -1.000000e+02 : f32
    %33 = vector.broadcast %cst_32 : f32 to vector<16x16xf32>
    %34 = arith.maximumf %32, %33 : vector<16x16xf32>
    %cst_33 = arith.constant 1.000000e+00 : f32
    %35 = vector.broadcast %cst_33 : f32 to vector<16x16xf32>
    %36 = arith.subf %35, %31 : vector<16x16xf32>
    %37 = math.log %36 : vector<16x16xf32>
    %cst_34 = arith.constant -1.000000e+02 : f32
    %38 = vector.broadcast %cst_34 : f32 to vector<16x16xf32>
    %39 = arith.maximumf %37, %38 : vector<16x16xf32>
    %40 = arith.mulf %15, %34 : vector<16x16xf32>
    %cst_35 = arith.constant 1.000000e+00 : f32
    %41 = vector.broadcast %cst_35 : f32 to vector<16x16xf32>
    %42 = arith.subf %41, %15 : vector<16x16xf32>
    %43 = arith.mulf %42, %39 : vector<16x16xf32>
    %44 = arith.addf %40, %43 : vector<16x16xf32>
    %cst_36 = arith.constant 0.000000e+00 : f32
    %45 = vector.broadcast %cst_36 : f32 to vector<16x16xf32>
    %46 = arith.subf %45, %44 : vector<16x16xf32>
    %47 = math.log %7 : vector<16x16xf32>
    %cst_37 = arith.constant -1.000000e+02 : f32
    %48 = vector.broadcast %cst_37 : f32 to vector<16x16xf32>
    %49 = arith.maximumf %47, %48 : vector<16x16xf32>
    %cst_38 = arith.constant 1.000000e+00 : f32
    %50 = vector.broadcast %cst_38 : f32 to vector<16x16xf32>
    %51 = arith.subf %50, %7 : vector<16x16xf32>
    %52 = math.log %51 : vector<16x16xf32>
    %cst_39 = arith.constant -1.000000e+02 : f32
    %53 = vector.broadcast %cst_39 : f32 to vector<16x16xf32>
    %54 = arith.maximumf %52, %53 : vector<16x16xf32>
    %55 = arith.mulf %15, %49 : vector<16x16xf32>
    %cst_40 = arith.constant 1.000000e+00 : f32
    %56 = vector.broadcast %cst_40 : f32 to vector<16x16xf32>
    %57 = arith.subf %56, %15 : vector<16x16xf32>
    %58 = arith.mulf %57, %54 : vector<16x16xf32>
    %59 = arith.addf %55, %58 : vector<16x16xf32>
    %cst_41 = arith.constant 0.000000e+00 : f32
    %60 = vector.broadcast %cst_41 : f32 to vector<16x16xf32>
    %61 = arith.subf %60, %59 : vector<16x16xf32>
    %62 = arith.mulf %1, %9 : vector<16x16xf32>
    %63 = arith.addf %1, %9 : vector<16x16xf32>
    %64 = arith.subf %3, %11 : vector<16x16xf32>
    %65 = arith.subf %5, %13 : vector<16x16xf32>
    %66 = arith.mulf %64, %64 : vector<16x16xf32>
    %67 = arith.mulf %65, %65 : vector<16x16xf32>
    %68 = arith.addf %66, %67 : vector<16x16xf32>
    %cst_42 = arith.constant 0.000000e+00 : f32
    %69 = vector.broadcast %cst_42 : f32 to vector<20x20xf32>
    %c0_43 = arith.constant 0 : index
    %c0_44 = arith.constant 0 : index
    %70 = vector.load %arg4[%c0_43, %c0_44] : memref<20x20xf32, #tpu.memory_space<vmem>>, vector<20x20xf32>
    tpu.vector_store %arg4[%c0_43, %c0_44], %69 {strides = array<i32>} : memref<20x20xf32, #tpu.memory_space<vmem>>, vector<20x20xf32>,
    %cst_45 = arith.constant 0.000000e+00 : f32
    %71 = vector.broadcast %cst_45 : f32 to vector<20x20xf32>
    %c0_46 = arith.constant 0 : index
    %c0_47 = arith.constant 0 : index
    %72 = vector.load %arg5[%c0_46, %c0_47] : memref<20x20xf32, #tpu.memory_space<vmem>>, vector<20x20xf32>
    tpu.vector_store %arg5[%c0_46, %c0_47], %71 {strides = array<i32>} : memref<20x20xf32, #tpu.memory_space<vmem>>, vector<20x20xf32>,
    %c2_48 = arith.constant 2 : index
    %c2_49 = arith.constant 2 : index
    %73 = vector.load %arg4[%c2_48, %c2_49] : memref<20x20xf32, #tpu.memory_space<vmem>>, vector<16x16xf32>
    tpu.vector_store %arg4[%c2_48, %c2_49], %64 {strides = array<i32>} : memref<20x20xf32, #tpu.memory_space<vmem>>, vector<16x16xf32>,
    %c2_50 = arith.constant 2 : index
    %c2_51 = arith.constant 2 : index
    %74 = vector.load %arg5[%c2_50, %c2_51] : memref<20x20xf32, #tpu.memory_space<vmem>>, vector<16x16xf32>
    tpu.vector_store %arg5[%c2_50, %c2_51], %65 {strides = array<i32>} : memref<20x20xf32, #tpu.memory_space<vmem>>, vector<16x16xf32>,
    %cst_52 = arith.constant 0.000000e+00 : f32
    %75 = vector.broadcast %cst_52 : f32 to vector<16x16xf32>
    %cst_53 = arith.constant 0.000000e+00 : f32
    %76 = vector.broadcast %cst_53 : f32 to vector<16x16xf32>
    %c0_54 = arith.constant 0 : index
    %c0_55 = arith.constant 0 : index
    %77 = vector.load %arg4[%c0_54, %c0_55] : memref<20x20xf32, #tpu.memory_space<vmem>>, vector<16x20xf32>
    %c0_56 = arith.constant 0 : index
    %c0_57 = arith.constant 0 : index
    %78 = vector.load %arg5[%c0_56, %c0_57] : memref<20x20xf32, #tpu.memory_space<vmem>>, vector<16x20xf32>
    %79 = vector.extract_strided_slice %77 {offsets = [0, 0], sizes = [16, 16], strides = [1, 1]} : vector<16x20xf32> to vector<16x16xf32>
    %cst_58 = arith.constant -2.500000e-01 : f32
    %80 = vector.broadcast %cst_58 : f32 to vector<16x16xf32>
    %81 = arith.mulf %80, %79 : vector<16x16xf32>
    %82 = arith.addf %75, %81 : vector<16x16xf32>
    %83 = vector.extract_strided_slice %78 {offsets = [0, 0], sizes = [16, 16], strides = [1, 1]} : vector<16x20xf32> to vector<16x16xf32>
    %cst_59 = arith.constant -2.500000e-01 : f32
    %84 = vector.broadcast %cst_59 : f32 to vector<16x16xf32>
    %85 = arith.mulf %84, %83 : vector<16x16xf32>
    %86 = arith.addf %76, %85 : vector<16x16xf32>
    %87 = vector.extract_strided_slice %77 {offsets = [0, 1], sizes = [16, 16], strides = [1, 1]} : vector<16x20xf32> to vector<16x16xf32>
    %cst_60 = arith.constant -2.000000e-01 : f32
    %88 = vector.broadcast %cst_60 : f32 to vector<16x16xf32>
    %89 = arith.mulf %88, %87 : vector<16x16xf32>
    %90 = arith.addf %82, %89 : vector<16x16xf32>
    %91 = vector.extract_strided_slice %78 {offsets = [0, 1], sizes = [16, 16], strides = [1, 1]} : vector<16x20xf32> to vector<16x16xf32>
    %cst_61 = arith.constant -4.000000e-01 : f32
    %92 = vector.broadcast %cst_61 : f32 to vector<16x16xf32>
    %93 = arith.mulf %92, %91 : vector<16x16xf32>
    %94 = arith.addf %86, %93 : vector<16x16xf32>
    %95 = vector.extract_strided_slice %78 {offsets = [0, 2], sizes = [16, 16], strides = [1, 1]} : vector<16x20xf32> to vector<16x16xf32>
    %cst_62 = arith.constant -5.000000e-01 : f32
    %96 = vector.broadcast %cst_62 : f32 to vector<16x16xf32>
    %97 = arith.mulf %96, %95 : vector<16x16xf32>
    %98 = arith.addf %94, %97 : vector<16x16xf32>
    %99 = vector.extract_strided_slice %77 {offsets = [0, 3], sizes = [16, 16], strides = [1, 1]} : vector<16x20xf32> to vector<16x16xf32>
    %cst_63 = arith.constant 2.000000e-01 : f32
    %100 = vector.broadcast %cst_63 : f32 to vector<16x16xf32>
    %101 = arith.mulf %100, %99 : vector<16x16xf32>
    %102 = arith.addf %90, %101 : vector<16x16xf32>
    %103 = vector.extract_strided_slice %78 {offsets = [0, 3], sizes = [16, 16], strides = [1, 1]} : vector<16x20xf32> to vector<16x16xf32>
    %cst_64 = arith.constant -4.000000e-01 : f32
    %104 = vector.broadcast %cst_64 : f32 to vector<16x16xf32>
    %105 = arith.mulf %104, %103 : vector<16x16xf32>
    %106 = arith.addf %98, %105 : vector<16x16xf32>
    %107 = vector.extract_strided_slice %77 {offsets = [0, 4], sizes = [16, 16], strides = [1, 1]} : vector<16x20xf32> to vector<16x16xf32>
    %cst_65 = arith.constant 2.500000e-01 : f32
    %108 = vector.broadcast %cst_65 : f32 to vector<16x16xf32>
    %109 = arith.mulf %108, %107 : vector<16x16xf32>
    %110 = arith.addf %102, %109 : vector<16x16xf32>
    %111 = vector.extract_strided_slice %78 {offsets = [0, 4], sizes = [16, 16], strides = [1, 1]} : vector<16x20xf32> to vector<16x16xf32>
    %cst_66 = arith.constant -2.500000e-01 : f32
    %112 = vector.broadcast %cst_66 : f32 to vector<16x16xf32>
    %113 = arith.mulf %112, %111 : vector<16x16xf32>
    %114 = arith.addf %106, %113 : vector<16x16xf32>
    %c1_67 = arith.constant 1 : index
    %c0_68 = arith.constant 0 : index
    %115 = vector.load %arg4[%c1_67, %c0_68] : memref<20x20xf32, #tpu.memory_space<vmem>>, vector<16x20xf32>
    %c1_69 = arith.constant 1 : index
    %c0_70 = arith.constant 0 : index
    %116 = vector.load %arg5[%c1_69, %c0_70] : memref<20x20xf32, #tpu.memory_space<vmem>>, vector<16x20xf32>
    %117 = vector.extract_strided_slice %115 {offsets = [0, 0], sizes = [16, 16], strides = [1, 1]} : vector<16x20xf32> to vector<16x16xf32>
    %cst_71 = arith.constant -4.000000e-01 : f32
    %118 = vector.broadcast %cst_71 : f32 to vector<16x16xf32>
    %119 = arith.mulf %118, %117 : vector<16x16xf32>
    %120 = arith.addf %110, %119 : vector<16x16xf32>
    %121 = vector.extract_strided_slice %116 {offsets = [0, 0], sizes = [16, 16], strides = [1, 1]} : vector<16x20xf32> to vector<16x16xf32>
    %cst_72 = arith.constant -2.000000e-01 : f32
    %122 = vector.broadcast %cst_72 : f32 to vector<16x16xf32>
    %123 = arith.mulf %122, %121 : vector<16x16xf32>
    %124 = arith.addf %114, %123 : vector<16x16xf32>
    %125 = vector.extract_strided_slice %115 {offsets = [0, 1], sizes = [16, 16], strides = [1, 1]} : vector<16x20xf32> to vector<16x16xf32>
    %cst_73 = arith.constant -5.000000e-01 : f32
    %126 = vector.broadcast %cst_73 : f32 to vector<16x16xf32>
    %127 = arith.mulf %126, %125 : vector<16x16xf32>
    %128 = arith.addf %120, %127 : vector<16x16xf32>
    %129 = vector.extract_strided_slice %116 {offsets = [0, 1], sizes = [16, 16], strides = [1, 1]} : vector<16x20xf32> to vector<16x16xf32>
    %cst_74 = arith.constant -5.000000e-01 : f32
    %130 = vector.broadcast %cst_74 : f32 to vector<16x16xf32>
    %131 = arith.mulf %130, %129 : vector<16x16xf32>
    %132 = arith.addf %124, %131 : vector<16x16xf32>
    %133 = vector.extract_strided_slice %116 {offsets = [0, 2], sizes = [16, 16], strides = [1, 1]} : vector<16x20xf32> to vector<16x16xf32>
    %cst_75 = arith.constant -1.000000e+00 : f32
    %134 = vector.broadcast %cst_75 : f32 to vector<16x16xf32>
    %135 = arith.mulf %134, %133 : vector<16x16xf32>
    %136 = arith.addf %132, %135 : vector<16x16xf32>
    %137 = vector.extract_strided_slice %115 {offsets = [0, 3], sizes = [16, 16], strides = [1, 1]} : vector<16x20xf32> to vector<16x16xf32>
    %cst_76 = arith.constant 5.000000e-01 : f32
    %138 = vector.broadcast %cst_76 : f32 to vector<16x16xf32>
    %139 = arith.mulf %138, %137 : vector<16x16xf32>
    %140 = arith.addf %128, %139 : vector<16x16xf32>
    %141 = vector.extract_strided_slice %116 {offsets = [0, 3], sizes = [16, 16], strides = [1, 1]} : vector<16x20xf32> to vector<16x16xf32>
    %cst_77 = arith.constant -5.000000e-01 : f32
    %142 = vector.broadcast %cst_77 : f32 to vector<16x16xf32>
    %143 = arith.mulf %142, %141 : vector<16x16xf32>
    %144 = arith.addf %136, %143 : vector<16x16xf32>
    %145 = vector.extract_strided_slice %115 {offsets = [0, 4], sizes = [16, 16], strides = [1, 1]} : vector<16x20xf32> to vector<16x16xf32>
    %cst_78 = arith.constant 4.000000e-01 : f32
    %146 = vector.broadcast %cst_78 : f32 to vector<16x16xf32>
    %147 = arith.mulf %146, %145 : vector<16x16xf32>
    %148 = arith.addf %140, %147 : vector<16x16xf32>
    %149 = vector.extract_strided_slice %116 {offsets = [0, 4], sizes = [16, 16], strides = [1, 1]} : vector<16x20xf32> to vector<16x16xf32>
    %cst_79 = arith.constant -2.000000e-01 : f32
    %150 = vector.broadcast %cst_79 : f32 to vector<16x16xf32>
    %151 = arith.mulf %150, %149 : vector<16x16xf32>
    %152 = arith.addf %144, %151 : vector<16x16xf32>
    %c2_80 = arith.constant 2 : index
    %c0_81 = arith.constant 0 : index
    %153 = vector.load %arg4[%c2_80, %c0_81] : memref<20x20xf32, #tpu.memory_space<vmem>>, vector<16x20xf32>
    %154 = vector.extract_strided_slice %153 {offsets = [0, 0], sizes = [16, 16], strides = [1, 1]} : vector<16x20xf32> to vector<16x16xf32>
    %cst_82 = arith.constant -5.000000e-01 : f32
    %155 = vector.broadcast %cst_82 : f32 to vector<16x16xf32>
    %156 = arith.mulf %155, %154 : vector<16x16xf32>
    %157 = arith.addf %148, %156 : vector<16x16xf32>
    %158 = vector.extract_strided_slice %153 {offsets = [0, 1], sizes = [16, 16], strides = [1, 1]} : vector<16x20xf32> to vector<16x16xf32>
    %cst_83 = arith.constant -1.000000e+00 : f32
    %159 = vector.broadcast %cst_83 : f32 to vector<16x16xf32>
    %160 = arith.mulf %159, %158 : vector<16x16xf32>
    %161 = arith.addf %157, %160 : vector<16x16xf32>
    %162 = vector.extract_strided_slice %153 {offsets = [0, 3], sizes = [16, 16], strides = [1, 1]} : vector<16x20xf32> to vector<16x16xf32>
    %cst_84 = arith.constant 1.000000e+00 : f32
    %163 = vector.broadcast %cst_84 : f32 to vector<16x16xf32>
    %164 = arith.mulf %163, %162 : vector<16x16xf32>
    %165 = arith.addf %161, %164 : vector<16x16xf32>
    %166 = vector.extract_strided_slice %153 {offsets = [0, 4], sizes = [16, 16], strides = [1, 1]} : vector<16x20xf32> to vector<16x16xf32>
    %cst_85 = arith.constant 5.000000e-01 : f32
    %167 = vector.broadcast %cst_85 : f32 to vector<16x16xf32>
    %168 = arith.mulf %167, %166 : vector<16x16xf32>
    %169 = arith.addf %165, %168 : vector<16x16xf32>
    %c3_86 = arith.constant 3 : index
    %c0_87 = arith.constant 0 : index
    %170 = vector.load %arg4[%c3_86, %c0_87] : memref<20x20xf32, #tpu.memory_space<vmem>>, vector<16x20xf32>
    %c3_88 = arith.constant 3 : index
    %c0_89 = arith.constant 0 : index
    %171 = vector.load %arg5[%c3_88, %c0_89] : memref<20x20xf32, #tpu.memory_space<vmem>>, vector<16x20xf32>
    %172 = vector.extract_strided_slice %170 {offsets = [0, 0], sizes = [16, 16], strides = [1, 1]} : vector<16x20xf32> to vector<16x16xf32>
    %cst_90 = arith.constant -4.000000e-01 : f32
    %173 = vector.broadcast %cst_90 : f32 to vector<16x16xf32>
    %174 = arith.mulf %173, %172 : vector<16x16xf32>
    %175 = arith.addf %169, %174 : vector<16x16xf32>
    %176 = vector.extract_strided_slice %171 {offsets = [0, 0], sizes = [16, 16], strides = [1, 1]} : vector<16x20xf32> to vector<16x16xf32>
    %cst_91 = arith.constant 2.000000e-01 : f32
    %177 = vector.broadcast %cst_91 : f32 to vector<16x16xf32>
    %178 = arith.mulf %177, %176 : vector<16x16xf32>
    %179 = arith.addf %152, %178 : vector<16x16xf32>
    %180 = vector.extract_strided_slice %170 {offsets = [0, 1], sizes = [16, 16], strides = [1, 1]} : vector<16x20xf32> to vector<16x16xf32>
    %cst_92 = arith.constant -5.000000e-01 : f32
    %181 = vector.broadcast %cst_92 : f32 to vector<16x16xf32>
    %182 = arith.mulf %181, %180 : vector<16x16xf32>
    %183 = arith.addf %175, %182 : vector<16x16xf32>
    %184 = vector.extract_strided_slice %171 {offsets = [0, 1], sizes = [16, 16], strides = [1, 1]} : vector<16x20xf32> to vector<16x16xf32>
    %cst_93 = arith.constant 5.000000e-01 : f32
    %185 = vector.broadcast %cst_93 : f32 to vector<16x16xf32>
    %186 = arith.mulf %185, %184 : vector<16x16xf32>
    %187 = arith.addf %179, %186 : vector<16x16xf32>
    %188 = vector.extract_strided_slice %171 {offsets = [0, 2], sizes = [16, 16], strides = [1, 1]} : vector<16x20xf32> to vector<16x16xf32>
    %cst_94 = arith.constant 1.000000e+00 : f32
    %189 = vector.broadcast %cst_94 : f32 to vector<16x16xf32>
    %190 = arith.mulf %189, %188 : vector<16x16xf32>
    %191 = arith.addf %187, %190 : vector<16x16xf32>
    %192 = vector.extract_strided_slice %170 {offsets = [0, 3], sizes = [16, 16], strides = [1, 1]} : vector<16x20xf32> to vector<16x16xf32>
    %cst_95 = arith.constant 5.000000e-01 : f32
    %193 = vector.broadcast %cst_95 : f32 to vector<16x16xf32>
    %194 = arith.mulf %193, %192 : vector<16x16xf32>
    %195 = arith.addf %183, %194 : vector<16x16xf32>
    %196 = vector.extract_strided_slice %171 {offsets = [0, 3], sizes = [16, 16], strides = [1, 1]} : vector<16x20xf32> to vector<16x16xf32>
    %cst_96 = arith.constant 5.000000e-01 : f32
    %197 = vector.broadcast %cst_96 : f32 to vector<16x16xf32>
    %198 = arith.mulf %197, %196 : vector<16x16xf32>
    %199 = arith.addf %191, %198 : vector<16x16xf32>
    %200 = vector.extract_strided_slice %170 {offsets = [0, 4], sizes = [16, 16], strides = [1, 1]} : vector<16x20xf32> to vector<16x16xf32>
    %cst_97 = arith.constant 4.000000e-01 : f32
    %201 = vector.broadcast %cst_97 : f32 to vector<16x16xf32>
    %202 = arith.mulf %201, %200 : vector<16x16xf32>
    %203 = arith.addf %195, %202 : vector<16x16xf32>
    %204 = vector.extract_strided_slice %171 {offsets = [0, 4], sizes = [16, 16], strides = [1, 1]} : vector<16x20xf32> to vector<16x16xf32>
    %cst_98 = arith.constant 2.000000e-01 : f32
    %205 = vector.broadcast %cst_98 : f32 to vector<16x16xf32>
    %206 = arith.mulf %205, %204 : vector<16x16xf32>
    %207 = arith.addf %199, %206 : vector<16x16xf32>
    %c4 = arith.constant 4 : index
    %c0_99 = arith.constant 0 : index
    %208 = vector.load %arg4[%c4, %c0_99] : memref<20x20xf32, #tpu.memory_space<vmem>>, vector<16x20xf32>
    %c4_100 = arith.constant 4 : index
    %c0_101 = arith.constant 0 : index
    %209 = vector.load %arg5[%c4_100, %c0_101] : memref<20x20xf32, #tpu.memory_space<vmem>>, vector<16x20xf32>
    %210 = vector.extract_strided_slice %208 {offsets = [0, 0], sizes = [16, 16], strides = [1, 1]} : vector<16x20xf32> to vector<16x16xf32>
    %cst_102 = arith.constant -2.500000e-01 : f32
    %211 = vector.broadcast %cst_102 : f32 to vector<16x16xf32>
    %212 = arith.mulf %211, %210 : vector<16x16xf32>
    %213 = arith.addf %203, %212 : vector<16x16xf32>
    %214 = vector.extract_strided_slice %209 {offsets = [0, 0], sizes = [16, 16], strides = [1, 1]} : vector<16x20xf32> to vector<16x16xf32>
    %cst_103 = arith.constant 2.500000e-01 : f32
    %215 = vector.broadcast %cst_103 : f32 to vector<16x16xf32>
    %216 = arith.mulf %215, %214 : vector<16x16xf32>
    %217 = arith.addf %207, %216 : vector<16x16xf32>
    %218 = vector.extract_strided_slice %208 {offsets = [0, 1], sizes = [16, 16], strides = [1, 1]} : vector<16x20xf32> to vector<16x16xf32>
    %cst_104 = arith.constant -2.000000e-01 : f32
    %219 = vector.broadcast %cst_104 : f32 to vector<16x16xf32>
    %220 = arith.mulf %219, %218 : vector<16x16xf32>
    %221 = arith.addf %213, %220 : vector<16x16xf32>
    %222 = vector.extract_strided_slice %209 {offsets = [0, 1], sizes = [16, 16], strides = [1, 1]} : vector<16x20xf32> to vector<16x16xf32>
    %cst_105 = arith.constant 4.000000e-01 : f32
    %223 = vector.broadcast %cst_105 : f32 to vector<16x16xf32>
    %224 = arith.mulf %223, %222 : vector<16x16xf32>
    %225 = arith.addf %217, %224 : vector<16x16xf32>
    %226 = vector.extract_strided_slice %209 {offsets = [0, 2], sizes = [16, 16], strides = [1, 1]} : vector<16x20xf32> to vector<16x16xf32>
    %cst_106 = arith.constant 5.000000e-01 : f32
    %227 = vector.broadcast %cst_106 : f32 to vector<16x16xf32>
    %228 = arith.mulf %227, %226 : vector<16x16xf32>
    %229 = arith.addf %225, %228 : vector<16x16xf32>
    %230 = vector.extract_strided_slice %208 {offsets = [0, 3], sizes = [16, 16], strides = [1, 1]} : vector<16x20xf32> to vector<16x16xf32>
    %cst_107 = arith.constant 2.000000e-01 : f32
    %231 = vector.broadcast %cst_107 : f32 to vector<16x16xf32>
    %232 = arith.mulf %231, %230 : vector<16x16xf32>
    %233 = arith.addf %221, %232 : vector<16x16xf32>
    %234 = vector.extract_strided_slice %209 {offsets = [0, 3], sizes = [16, 16], strides = [1, 1]} : vector<16x20xf32> to vector<16x16xf32>
    %cst_108 = arith.constant 4.000000e-01 : f32
    %235 = vector.broadcast %cst_108 : f32 to vector<16x16xf32>
    %236 = arith.mulf %235, %234 : vector<16x16xf32>
    %237 = arith.addf %229, %236 : vector<16x16xf32>
    %238 = vector.extract_strided_slice %208 {offsets = [0, 4], sizes = [16, 16], strides = [1, 1]} : vector<16x20xf32> to vector<16x16xf32>
    %cst_109 = arith.constant 2.500000e-01 : f32
    %239 = vector.broadcast %cst_109 : f32 to vector<16x16xf32>
    %240 = arith.mulf %239, %238 : vector<16x16xf32>
    %241 = arith.addf %233, %240 : vector<16x16xf32>
    %242 = vector.extract_strided_slice %209 {offsets = [0, 4], sizes = [16, 16], strides = [1, 1]} : vector<16x20xf32> to vector<16x16xf32>
    %cst_110 = arith.constant 2.500000e-01 : f32
    %243 = vector.broadcast %cst_110 : f32 to vector<16x16xf32>
    %244 = arith.mulf %243, %242 : vector<16x16xf32>
    %245 = arith.addf %237, %244 : vector<16x16xf32>
    %246 = arith.mulf %241, %241 : vector<16x16xf32>
    %247 = arith.mulf %245, %245 : vector<16x16xf32>
    %248 = arith.addf %246, %247 : vector<16x16xf32>
    %cst_111 = arith.constant 5.000000e-01 : f32
    %249 = vector.broadcast %cst_111 : f32 to vector<16x16xf32>
    %250 = arith.cmpf oge, %7, %249 : vector<16x16xf32>
    %251 = arith.extui %250 : vector<16x16xi1> to vector<16x16xi32>
    %252 = arith.sitofp %251 : vector<16x16xi32> to vector<16x16xf32>
    %253 = arith.mulf %252, %3 : vector<16x16xf32>
    %254 = arith.mulf %15, %11 : vector<16x16xf32>
    %255 = arith.subf %253, %254 : vector<16x16xf32>
    %256 = arith.mulf %252, %5 : vector<16x16xf32>
    %257 = arith.mulf %15, %13 : vector<16x16xf32>
    %258 = arith.subf %256, %257 : vector<16x16xf32>
    %259 = arith.mulf %255, %255 : vector<16x16xf32>
    %260 = arith.mulf %258, %258 : vector<16x16xf32>
    %261 = arith.addf %259, %260 : vector<16x16xf32>
    %cst_112 = arith.constant dense<0.000000e+00> : vector<16xf32>
    %262 = vector.multi_reduction <add>, %30, %cst_112 [0] : vector<16x16xf32> to vector<16xf32>
    %263 = vector.shape_cast %262 : vector<16xf32> to vector<1x16xf32>
    %c0_113 = arith.constant 0 : index
    %c0_114 = arith.constant 0 : index
    %c0_115 = arith.constant 0 : index
    %264 = vector.load %arg3[%c0_113, %c0_114, %c0_115] : memref<1x8x16xf32, #tpu.memory_space<vmem>>, vector<1x1x16xf32>
    %265 = vector.shape_cast %264 : vector<1x1x16xf32> to vector<1x16xf32>
    %266 = vector.shape_cast %263 : vector<1x16xf32> to vector<1x1x16xf32>
    tpu.vector_store %arg3[%c0_113, %c0_114, %c0_115], %266 {strides = array<i32>} : memref<1x8x16xf32, #tpu.memory_space<vmem>>, vector<1x1x16xf32>,
    %cst_116 = arith.constant dense<0.000000e+00> : vector<16xf32>
    %267 = vector.multi_reduction <add>, %46, %cst_116 [0] : vector<16x16xf32> to vector<16xf32>
    %268 = vector.shape_cast %267 : vector<16xf32> to vector<1x16xf32>
    %c0_117 = arith.constant 0 : index
    %c1_118 = arith.constant 1 : index
    %c0_119 = arith.constant 0 : index
    %269 = vector.load %arg3[%c0_117, %c1_118, %c0_119] : memref<1x8x16xf32, #tpu.memory_space<vmem>>, vector<1x1x16xf32>
    %270 = vector.shape_cast %269 : vector<1x1x16xf32> to vector<1x16xf32>
    %271 = vector.shape_cast %268 : vector<1x16xf32> to vector<1x1x16xf32>
    tpu.vector_store %arg3[%c0_117, %c1_118, %c0_119], %271 {strides = array<i32>} : memref<1x8x16xf32, #tpu.memory_space<vmem>>, vector<1x1x16xf32>,
    %cst_120 = arith.constant dense<0.000000e+00> : vector<16xf32>
    %272 = vector.multi_reduction <add>, %61, %cst_120 [0] : vector<16x16xf32> to vector<16xf32>
    %273 = vector.shape_cast %272 : vector<16xf32> to vector<1x16xf32>
    %c0_121 = arith.constant 0 : index
    %c2_122 = arith.constant 2 : index
    %c0_123 = arith.constant 0 : index
    %274 = vector.load %arg3[%c0_121, %c2_122, %c0_123] : memref<1x8x16xf32, #tpu.memory_space<vmem>>, vector<1x1x16xf32>
    %275 = vector.shape_cast %274 : vector<1x1x16xf32> to vector<1x16xf32>
    %276 = vector.shape_cast %273 : vector<1x16xf32> to vector<1x1x16xf32>
    tpu.vector_store %arg3[%c0_121, %c2_122, %c0_123], %276 {strides = array<i32>} : memref<1x8x16xf32, #tpu.memory_space<vmem>>, vector<1x1x16xf32>,
    %cst_124 = arith.constant dense<0.000000e+00> : vector<16xf32>
    %277 = vector.multi_reduction <add>, %62, %cst_124 [0] : vector<16x16xf32> to vector<16xf32>
    %278 = vector.shape_cast %277 : vector<16xf32> to vector<1x16xf32>
    %c0_125 = arith.constant 0 : index
    %c3_126 = arith.constant 3 : index
    %c0_127 = arith.constant 0 : index
    %279 = vector.load %arg3[%c0_125, %c3_126, %c0_127] : memref<1x8x16xf32, #tpu.memory_space<vmem>>, vector<1x1x16xf32>
    %280 = vector.shape_cast %279 : vector<1x1x16xf32> to vector<1x16xf32>
    %281 = vector.shape_cast %278 : vector<1x16xf32> to vector<1x1x16xf32>
    tpu.vector_store %arg3[%c0_125, %c3_126, %c0_127], %281 {strides = array<i32>} : memref<1x8x16xf32, #tpu.memory_space<vmem>>, vector<1x1x16xf32>,
    %cst_128 = arith.constant dense<0.000000e+00> : vector<16xf32>
    %282 = vector.multi_reduction <add>, %63, %cst_128 [0] : vector<16x16xf32> to vector<16xf32>
    %283 = vector.shape_cast %282 : vector<16xf32> to vector<1x16xf32>
    %c0_129 = arith.constant 0 : index
    %c4_130 = arith.constant 4 : index
    %c0_131 = arith.constant 0 : index
    %284 = vector.load %arg3[%c0_129, %c4_130, %c0_131] : memref<1x8x16xf32, #tpu.memory_space<vmem>>, vector<1x1x16xf32>
    %285 = vector.shape_cast %284 : vector<1x1x16xf32> to vector<1x16xf32>
    %286 = vector.shape_cast %283 : vector<1x16xf32> to vector<1x1x16xf32>
    tpu.vector_store %arg3[%c0_129, %c4_130, %c0_131], %286 {strides = array<i32>} : memref<1x8x16xf32, #tpu.memory_space<vmem>>, vector<1x1x16xf32>,
    %cst_132 = arith.constant dense<0.000000e+00> : vector<16xf32>
    %287 = vector.multi_reduction <add>, %68, %cst_132 [0] : vector<16x16xf32> to vector<16xf32>
    %288 = vector.shape_cast %287 : vector<16xf32> to vector<1x16xf32>
    %c0_133 = arith.constant 0 : index
    %c5 = arith.constant 5 : index
    %c0_134 = arith.constant 0 : index
    %289 = vector.load %arg3[%c0_133, %c5, %c0_134] : memref<1x8x16xf32, #tpu.memory_space<vmem>>, vector<1x1x16xf32>
    %290 = vector.shape_cast %289 : vector<1x1x16xf32> to vector<1x16xf32>
    %291 = vector.shape_cast %288 : vector<1x16xf32> to vector<1x1x16xf32>
    tpu.vector_store %arg3[%c0_133, %c5, %c0_134], %291 {strides = array<i32>} : memref<1x8x16xf32, #tpu.memory_space<vmem>>, vector<1x1x16xf32>,
    %cst_135 = arith.constant dense<0.000000e+00> : vector<16xf32>
    %292 = vector.multi_reduction <add>, %248, %cst_135 [0] : vector<16x16xf32> to vector<16xf32>
    %293 = vector.shape_cast %292 : vector<16xf32> to vector<1x16xf32>
    %c0_136 = arith.constant 0 : index
    %c6 = arith.constant 6 : index
    %c0_137 = arith.constant 0 : index
    %294 = vector.load %arg3[%c0_136, %c6, %c0_137] : memref<1x8x16xf32, #tpu.memory_space<vmem>>, vector<1x1x16xf32>
    %295 = vector.shape_cast %294 : vector<1x1x16xf32> to vector<1x16xf32>
    %296 = vector.shape_cast %293 : vector<1x16xf32> to vector<1x1x16xf32>
    tpu.vector_store %arg3[%c0_136, %c6, %c0_137], %296 {strides = array<i32>} : memref<1x8x16xf32, #tpu.memory_space<vmem>>, vector<1x1x16xf32>,
    %cst_138 = arith.constant dense<0.000000e+00> : vector<16xf32>
    %297 = vector.multi_reduction <add>, %261, %cst_138 [0] : vector<16x16xf32> to vector<16xf32>
    %298 = vector.shape_cast %297 : vector<16xf32> to vector<1x16xf32>
    %c0_139 = arith.constant 0 : index
    %c7 = arith.constant 7 : index
    %c0_140 = arith.constant 0 : index
    %299 = vector.load %arg3[%c0_139, %c7, %c0_140] : memref<1x8x16xf32, #tpu.memory_space<vmem>>, vector<1x1x16xf32>
    %300 = vector.shape_cast %299 : vector<1x1x16xf32> to vector<1x16xf32>
    %301 = vector.shape_cast %298 : vector<1x16xf32> to vector<1x1x16xf32>
    tpu.vector_store %arg3[%c0_139, %c7, %c0_140], %301 {strides = array<i32>} : memref<1x8x16xf32, #tpu.memory_space<vmem>>, vector<1x1x16xf32>,
    return
  }
  func.func @transform_0(%arg0: i32) -> (i32, i32, i32, i32) {
    %c0_i32 = arith.constant 0 : i32
    %c0_i32_0 = arith.constant 0 : i32
    %c0_i32_1 = arith.constant 0 : i32
    %c0_i32_2 = arith.constant 0 : i32
    return %arg0, %c0_i32, %c0_i32_0, %c0_i32_1 : i32, i32, i32, i32
  }
  func.func @transform_1(%arg0: i32) -> (i32, i32, i32, i32) {
    %c0_i32 = arith.constant 0 : i32
    %c0_i32_0 = arith.constant 0 : i32
    %c0_i32_1 = arith.constant 0 : i32
    %c0_i32_2 = arith.constant 0 : i32
    return %arg0, %c0_i32, %c0_i32_0, %c0_i32_1 : i32, i32, i32, i32
  }
  func.func @transform_2(%arg0: i32) -> (i32, i32, i32) {
    %c0_i32 = arith.constant 0 : i32
    %c0_i32_0 = arith.constant 0 : i32
    %c0_i32_1 = arith.constant 0 : i32
    return %arg0, %c0_i32, %c0_i32_0 : i32, i32, i32
  }
}

</mosaic_0001>

<bundles_post_ra>
// kernel: custom_loss.1
= control target key start
LH: loop header
LB: loop body
LE: loop exit
PB: predicated region body
PF: predicated region fallthrough
CT: control target
= control target key end

     0   :  { %s969_s9 = smov 0   ;;  %s1273_s0 = inlined_call_operand.vmem [shape: f32[2,4,16,16], index: 0, kind: input, shape index: {}]   ;;  %s1274_s1 = inlined_call_operand.vmem [shape: f32[2,4,16,16], index: 1, kind: input, shape index: {}]   ;;  %s1275_s2 = inlined_call_operand.vmem [shape: f32[2,8,16], index: 2, kind: output, shape index: {}]  }
   0x1 LB: > { %s874_s10 = sadd.s32 4294967295, %s946_s9   ;;  %p878_p0 = scmp.ge.s32.totalorder %s946_s9, 1  ;;  %s946_s9 = sphi %s969_s9, %s12_s9  }
   0x2   : > { %p122_p1 = scmp.lt.s32.totalorder %s946_s9, 3 }
   0x4   : > { %p123_p2 = pnand %p878_p0, %p122_p1 }
   0x5   : > { %p148_p3 = scmp.lt.s32.totalorder (!%p123_p2), %s874_s10, 1  ;;  %vm270_vm0 = vcmask (!%p123_p2), 162816   ;;  %v948_v0 = vmov (!%p123_p2), 0.0   ;;  %vm273_vm1 = vcmask (!%p123_p2), 158720   ;;  %vm727_vm3 = vcmask (!%p123_p2), 130048   ;;  %s949_s18 = smov (!%p123_p2), 2  }
   0x6   : > { %126 = sbr.rel (%p123_p2) target bundleno = 426 (0x1aa), region = 28  ;;  %275 = vst.msk [vmem:[#allocation3] sm:$0xff] (!%p123_p2), %vm270_vm0, %v948_v0  ;;  %276 = vst.msk [vmem:[#allocation3 + $0x8] sm:$0xff] (!%p123_p2), %vm270_vm0, %v948_v0  ;;  %vm737_vm4 = vcmask (!%p123_p2), 122880   ;;  %vm286_vm6 = vcmask (!%p123_p2), 146448   ;;  %s950_s23 = smov (!%p123_p2), 125  }
   0x7   : > { %271 = vst.msk [vmem:[#allocation2] sm:$0xff] (!%p123_p2), %vm270_vm0, %v948_v0  ;;  %272 = vst.msk [vmem:[#allocation2 + $0x8] sm:$0xff] (!%p123_p2), %vm270_vm0, %v948_v0  ;;  %s951_s24 = smov (!%p123_p2), 126   ;;  %s952_s25 = smov (!%p123_p2), 127  }
   0x8   : > { %277 = vst.msk [vmem:[#allocation3 + $0x10] sm:$0xf] (!%p123_p2), %vm273_vm1, %v948_v0  ;;  %274 = vst.msk [vmem:[#allocation2 + $0x10] sm:$0xf] (!%p123_p2), %vm273_vm1, %v948_v0  ;;  %s953_s26 = smov (!%p123_p2), 124  }
   0xd   : > { %s1277_s10 = smov (!%p148_p3, %s874_s10), 1 }
   0xe   : > { %s900_s11 = sshll.u32 %s1277_s10, 6  ;;  %s883_s19 = sshll.u32 %s1277_s10, 3 }
   0xf   : > { %s987_s14 = scalar_lea.vmem %s1273_s0, %s900_s11  ;;  %s992_s17 = scalar_lea.vmem %s1274_s1, %s900_s11 }
  0x10   : > { %v886_v1 = vld [vmem:[%s987_s14 + $0x20] sm:$0xff]  ;;  %v888_v2 = vld [vmem:[%s987_s14 + $0x30] sm:$0xff]  ;;  %v163_v10 = vld [vmem:[%s987_s14 + $0x8] sm:$0xff]  ;;  %s1045_s22 = scalar_lea.vmem %s1275_s2, %s883_s19 }
  0x11   : > { %v999_v3 = vld [vmem:[%s992_s17] sm:$0xff]  ;;  %v1003_v5 = vld [vmem:[%s992_s17 + $0x30] sm:$0xff]  ;;  %916 = vlog2.f32 %v888_v2  ;;  %v240_v6 = vsub.f32 1.0, %v888_v2  ;;  %vm703_vm2 = vcmp.ge.f32.partialorder %v888_v2, 0.5  ;;  %v1011_v13 = vld [vmem:[%s992_s17 + $0x8] sm:$0xff]  ;;  %v191_v16 = vsub.f32 1.0, %v163_v10 }
  0x12   : > { %v892_v4 = vld [vmem:[%s992_s17 + $0x20] sm:$0xff]  ;;  %v208_v7 = vmul.f32 %v1003_v5, %v888_v2  ;;  %v200_v11 = vsub.f32 1.0, %v999_v3  ;;  %v896_v12 = vsel %vm703_vm2, 1.0, %v948_v0  ;;  %v257_v18 = vmul.f32 %v1011_v13, %v163_v10  ;;  %v884_v23 = vld [vmem:[%s987_s14 + $0x10] sm:$0xff]  ;;  %v1025_v28 = vld [vmem:[%s987_s14 + $0x38] sm:$0xff] }
  0x13   : > { %v262_v8 = vsub.f32 %v886_v1, %v892_v4  ;;  %v162_v9 = vld [vmem:[%s987_s14] sm:$0xff]  ;;  %918 = vlog2.f32 %v240_v6  ;;  %v715_v20 = vmul.f32 %v896_v12, %v886_v1  ;;  %v717_v21 = vmul.f32 %v1003_v5, %v892_v4  ;;  %v890_v24 = vld [vmem:[%s992_s17 + $0x10] sm:$0xff]  ;;  %v1028_v29 = vld [vmem:[%s992_s17 + $0x38] sm:$0xff] }
  0x14   : > { %920 = vlog2.f32 %v208_v7  ;;  %v216_v14 = vsub.f32 1.0, %v208_v7  ;;  %v190_v15 = vsub.f32 1.0, %v162_v9  ;;  %v256_v17 = vmul.f32 %v999_v3, %v162_v9 }
  0x15   : > { %291 = vrot.lane.b32.xlu1 %v262_v8, %s949_s18  ;;  %922 = vlog2.f32 %v162_v9  ;;  %v258_v19 = vadd.f32 %v999_v3, %v162_v9  ;;  %v259_v22 = vadd.f32 %v1011_v13, %v163_v10  ;;  %v760_v26 = vsel %vm727_vm3, %v257_v18, 0.0 }
  0x16   : > { %924 = vlog2.f32 %v216_v14  ;;  %v759_v25 = vsel %vm727_vm3, %v256_v17, 0.0  ;;  %v201_v30 = vsub.f32 1.0, %v1011_v13  ;;  %v260_v34 = vsub.f32 %v884_v23, %v890_v24 }
  0x17   : > { %926 = vlog2.f32 %v163_v10  ;;  %v769_v27 = vsel %vm727_vm3, %v258_v19, 0.0  ;;  %v761_v31 = vadd.f32 %v760_v26, %v759_v25  ;;  %v770_v32 = vsel %vm727_vm3, %v259_v22, 0.0 }
  0x18   : > { %928 = vlog2.f32 %v190_v15  ;;  %v771_v33 = vadd.f32 %v770_v32, %v769_v27  ;;  %v709_v35 = vmul.f32 %v896_v12, %v884_v23  ;;  %v719_v36 = vsub.f32 %v715_v20, %v717_v21  ;;  %280 = vrot.lane.b32.xlu0 %v260_v34, %s949_s18 }
  0x19   : > { %930 = vlog2.f32 %v191_v16  ;;  %v762_v37 = vrot.slane %v761_v31, 4  ;;  %v711_v38 = vmul.f32 %v1003_v5, %v890_v24  ;;  %v209_v39 = vmul.f32 %v1028_v29, %v1025_v28 }
  0x1a   : > { %v226_v41 = vsub.f32 1.0, %v1003_v5  ;;  %v772_v42 = vrot.slane %v771_v33, 4  ;;  %932 = vlog2.f32 %v1025_v28  ;;  %v241_v43 = vsub.f32 1.0, %v1025_v28 }
  0x1b   : > { %v917_v40 = vpop.eup %916  ;;  %v266_v45 = vmul.f32 %v262_v8, %v262_v8  ;;  %v763_v46 = vadd.f32 %v762_v37, %v761_v31  ;;  %934 = vlog2.f32 %v209_v39  ;;  %v713_v49 = vsub.f32 %v709_v35, %v711_v38 }
  0x1c   : > { %v235_v44 = vmul.f32 0.6931472, %v917_v40  ;;  %v773_v48 = vadd.f32 %v772_v42, %v771_v33  ;;  %v217_v50 = vsub.f32 1.0, %v209_v39  ;;  %936 = vlog2.f32 %v241_v43  ;;  %v893_v33 = vld [vmem:[%s992_s17 + $0x28] sm:$0xff] }
  0x1d   : > { %v919_v47 = vpop.eup %918  ;;  %v723_v54 = vmul.f32 %v719_v36, %v719_v36  ;;  %v764_v55 = vrot.slane %v763_v46, 2  ;;  %v264_v59 = vmul.f32 %v260_v34, %v260_v34  ;;  %v721_v8 = vmul.f32 %v713_v49, %v713_v49 }
  0x1e   : > { %v921_v51 = vpop.eup %920  ;;  %v238_v52 = vmax.f32 %v235_v44, -100.0  ;;  %v243_v53 = vmul.f32 0.6931472, %v919_v47  ;;  %v774_v58 = vrot.slane %v773_v48, 2  ;;  %938 = vlog2.f32 %v217_v50 }
  0x1f   : > { %v923_v56 = vpop.eup %922  ;;  %v211_v57 = vmul.f32 0.6931472, %v921_v51  ;;  %v765_v1 = vadd.f32 %v764_v55, %v763_v46  ;;  %v268_v37 = vadd.f32 %v266_v45, %v264_v59  ;;  %v227_v38 = vsub.f32 1.0, %v1028_v29 }
  0x20   : > { %v925_v60 = vpop.eup %924  ;;  %v246_v61 = vmax.f32 %v243_v53, -100.0  ;;  %v248_v62 = vmul.f32 %v1003_v5, %v238_v52  ;;  %v185_v63 = vmul.f32 0.6931472, %v923_v56  ;;  %v775_v7 = vadd.f32 %v774_v58, %v773_v48  ;;  %v885_v56 = vld [vmem:[%s987_s14 + $0x18] sm:$0xff] }
  0x21   : > { %v927_v2 = vpop.eup %926  ;;  %v214_v4 = vmax.f32 %v211_v57, -100.0  ;;  %v219_v6 = vmul.f32 0.6931472, %v925_v60  ;;  %v766_v15 = vrot.slane %v765_v1, 1  ;;  %v725_v46 = vadd.f32 %v723_v54, %v721_v8  ;;  %v891_v57 = vld [vmem:[%s992_s17 + $0x18] sm:$0xff] }
  0x22   : > { %v929_v9 = vpop.eup %928  ;;  %v250_v10 = vmul.f32 %v246_v61, %v226_v41  ;;  %v187_v12 = vmul.f32 0.6931472, %v927_v2  ;;  %v188_v14 = vmax.f32 %v185_v63, -100.0  ;;  %v776_v20 = vrot.slane %v775_v7, 1 }
  0x23   : > { %v931_v16 = vpop.eup %930  ;;  %v222_v17 = vmax.f32 %v219_v6, -100.0  ;;  %v224_v18 = vmul.f32 %v1003_v5, %v214_v4  ;;  %v193_v19 = vmul.f32 0.6931472, %v929_v9  ;;  %v767_v31 = vadd.f32 %v766_v15, %v765_v1  ;;  %v887_v5 = vld [vmem:[%s987_s14 + $0x28] sm:$0xff] }
  0x24   : > { %v252_v21 = vadd.f32 %v250_v10, %v248_v62  ;;  %v189_v22 = vmax.f32 %v187_v12, -100.0  ;;  %v195_v23 = vmul.f32 0.6931472, %v931_v16  ;;  %v198_v24 = vmul.f32 %v188_v14, %v999_v3  ;;  %v933_v25 = vpop.eup %932 }
  0x25   : > { %v228_v26 = vmul.f32 %v226_v41, %v222_v17  ;;  %v196_v27 = vmax.f32 %v193_v19, -100.0  ;;  %v777_v32 = vadd.f32 %v776_v20, %v775_v7  ;;  %v935_v34 = vpop.eup %934  ;;  %v237_v43 = vmul.f32 0.6931472, %v933_v25  ;;  %768 = vst.msk [vmem:[%s1045_s22 + $0x3] sm:$0x1] %vm737_vm4, %v767_v31 }
  0x26   : > { %v197_v35 = vmax.f32 %v195_v23, -100.0  ;;  %v199_v36 = vmul.f32 %v189_v22, %v1011_v13  ;;  %v937_v39 = vpop.eup %936  ;;  %v213_v41 = vmul.f32 0.6931472, %v935_v34  ;;  %v263_v47 = vsub.f32 %v887_v5, %v893_v33 }
  0x27   : > { %v230_v40 = vadd.f32 %v228_v26, %v224_v18  ;;  %v202_v42 = vmul.f32 %v200_v11, %v196_v27  ;;  %778 = vst.msk [vmem:[%s1045_s22 + $0x4] sm:$0x1] %vm737_vm4, %v777_v32  ;;  %v245_v45 = vmul.f32 0.6931472, %v937_v39  ;;  %v254_v49 = vsub.f32 0.0, %v252_v21 }
  0x28   : > { %v203_v44 = vmul.f32 %v201_v30, %v197_v35  ;;  %v939_v48 = vpop.eup %938  ;;  %v215_v51 = vmax.f32 %v213_v41, -100.0  ;;  %v239_v3 = vmax.f32 %v237_v43, -100.0  ;;  %293 = vrot.lane.b32.xlu1 %v263_v47, %s949_s18  ;;  %v267_v54 = vmul.f32 %v263_v47, %v263_v47 }
  0x29   : > { %v204_v50 = vadd.f32 %v202_v42, %v198_v24  ;;  %v232_v11 = vsub.f32 0.0, %v230_v40  ;;  %v221_v53 = vmul.f32 0.6931472, %v939_v48  ;;  %v247_v55 = vmax.f32 %v245_v45, -100.0 }
  0x2a   : > { %v205_v52 = vadd.f32 %v203_v44, %v199_v36  ;;  %v225_v13 = vmul.f32 %v1028_v29, %v215_v51  ;;  %v249_v30 = vmul.f32 %v1028_v29, %v239_v3  ;;  %vm704_vm5 = vcmp.ge.f32.partialorder %v1025_v28, 0.5 }
  0x2b   : > { %v206_v58 = vsub.f32 0.0, %v204_v50  ;;  %v223_v60 = vmax.f32 %v221_v53, -100.0  ;;  %v251_v61 = vmul.f32 %v247_v55, %v227_v38  ;;  %v897_v63 = vsel %vm704_vm5, 1.0, %v948_v0 }
  0x2c   : > { %v207_v59 = vsub.f32 0.0, %v205_v52  ;;  %v718_v1 = vmul.f32 %v1028_v29, %v893_v33  ;;  %v261_v2 = vsub.f32 %v885_v56, %v891_v57  ;;  %v716_v8 = vmul.f32 %v897_v63, %v887_v5 }
  0x2d   : > { %v728_v62 = vsel %vm727_vm3, %v206_v58, 0.0  ;;  %v229_v6 = vmul.f32 %v227_v38, %v223_v60  ;;  %v253_v7 = vadd.f32 %v251_v61, %v249_v30  ;;  %v710_v12 = vmul.f32 %v897_v63, %v885_v56 }
  0x2e   : > { %v729_v4 = vsel %vm727_vm3, %v207_v59, 0.0  ;;  %v265_v10 = vmul.f32 %v261_v2, %v261_v2  ;;  %v712_v14 = vmul.f32 %v1028_v29, %v891_v57  ;;  %282 = vrot.lane.b32.xlu0 %v261_v2, %s949_s18  ;;  %v749_v28 = vsel %vm727_vm3, %v254_v49, 0.0 }
  0x2f   : > { %v730_v9 = vadd.f32 %v729_v4, %v728_v62  ;;  %v231_v15 = vadd.f32 %v229_v6, %v225_v13  ;;  %v255_v16 = vsub.f32 0.0, %v253_v7  ;;  %v720_v0 = vsub.f32 %v716_v8, %v718_v1 }
  0x30   : > { %v779_v18 = vsel %vm727_vm3, %v268_v37, 0.0  ;;  %v269_v19 = vadd.f32 %v267_v54, %v265_v10  ;;  %v714_v20 = vsub.f32 %v710_v12, %v712_v14  ;;  %v739_v21 = vsel %vm727_vm3, %v232_v11, 0.0 }
  0x31   : > { %v731_v17 = vrot.slane %v730_v9, 4  ;;  %v233_v22 = vsub.f32 0.0, %v231_v15  ;;  %v724_v23 = vmul.f32 %v720_v0, %v720_v0  ;;  %v750_v24 = vsel %vm727_vm3, %v255_v16, 0.0 }
  0x32   : > { %v751_v29 = vadd.f32 %v750_v24, %v749_v28  ;;  %v722_v26 = vmul.f32 %v714_v20, %v714_v20  ;;  %v780_v27 = vsel %vm727_vm3, %v269_v19, 0.0  ;;  %v799_v31 = vsel %vm727_vm3, %v725_v46, 0.0 }
  0x33   : > { %v732_v25 = vadd.f32 %v731_v17, %v730_v9  ;;  %v740_v32 = vsel %vm727_vm3, %v233_v22, 0.0  ;;  %v781_v5 = vadd.f32 %v780_v27, %v779_v18 }
  0x34   : > { %v741_v34 = vadd.f32 %v740_v32, %v739_v21  ;;  %v752_v35 = vrot.slane %v751_v29, 4  ;;  %v726_v36 = vadd.f32 %v724_v23, %v722_v26 }
  0x35   : > { %v733_v33 = vrot.slane %v732_v25, 2  ;;  %v782_v37 = vrot.slane %v781_v5, 4 }
  0x36   : > { %v742_v39 = vrot.slane %v741_v34, 4  ;;  %v753_v40 = vadd.f32 %v752_v35, %v751_v29  ;;  %v800_v42 = vsel %vm727_vm3, %v726_v36, 0.0 }
  0x37   : > { %v734_v38 = vadd.f32 %v733_v33, %v732_v25  ;;  %v801_v41 = vadd.f32 %v800_v42, %v799_v31  ;;  %v783_v43 = vadd.f32 %v782_v37, %v781_v5 }
  0x38   : > { %v743_v45 = vadd.f32 %v742_v39, %v741_v34  ;;  %v754_v47 = vrot.slane %v753_v40, 2 }
  0x39   : > { %v735_v44 = vrot.slane %v734_v38, 1  ;;  %v802_v46 = vrot.slane %v801_v41, 4  ;;  %v784_v48 = vrot.slane %v783_v43, 2 }
  0x3a   : > { %v744_v50 = vrot.slane %v743_v45, 2  ;;  %v755_v51 = vadd.f32 %v754_v47, %v753_v40 }
  0x3b   : > { %v736_v49 = vadd.f32 %v735_v44, %v734_v38  ;;  %v803_v3 = vadd.f32 %v802_v46, %v801_v41  ;;  %v785_v11 = vadd.f32 %v784_v48, %v783_v43 }
  0x3c   : > { %v745_v52 = vadd.f32 %v744_v50, %v743_v45  ;;  %v756_v53 = vrot.slane %v755_v51, 1 }
  0x3d   : > { %738 = vst.msk [vmem:[%s1045_s22] sm:$0x1] %vm737_vm4, %v736_v49  ;;  %v804_v55 = vrot.slane %v803_v3, 2  ;;  %v786_v56 = vrot.slane %v785_v11, 1 }
  0x3e   : > { %v746_v57 = vrot.slane %v745_v52, 1  ;;  %v757_v58 = vadd.f32 %v756_v53, %v755_v51 }
  0x3f   : > { %v805_v13 = vadd.f32 %v804_v55, %v803_v3  ;;  %v787_v30 = vadd.f32 %v786_v56, %v785_v11 }
  0x40   : > { %v747_v54 = vadd.f32 %v746_v57, %v745_v52  ;;  %758 = vst.msk [vmem:[%s1045_s22 + $0x2] sm:$0x1] %vm737_vm4, %v757_v58 }
  0x41   : > { %v806_v59 = vrot.slane %v805_v13, 1  ;;  %788 = vst.msk [vmem:[%s1045_s22 + $0x5] sm:$0x1] %vm737_vm4, %v787_v30 }
  0x42   : > { %748 = vst.msk [vmem:[%s1045_s22 + $0x1] sm:$0x1] %vm737_vm4, %v747_v54 }
  0x43   : > { %v807_v60 = vadd.f32 %v806_v59, %v805_v13 }
  0x45   : > { %808 = vst.msk [vmem:[%s1045_s22 + $0x7] sm:$0x1] %vm737_vm4, %v807_v60 }
  0x87   : > { %v292_v61 = vpop.permute.xlu1 %291 }
  0x88   : > { %297 = vst.msk [vmem:[#allocation3 + $0x2] sm:$0xff] %vm286_vm6, %v292_v61 }
  0x8a   : > { %v281_v62 = vpop.permute.xlu0 %280 }
  0x8b   : > { %287 = vst.msk [vmem:[#allocation2 + $0x2] sm:$0xff] %vm286_vm6, %v281_v62 }
  0x8f   : > { %v301_v8 = vld [vmem:[#allocation3] sm:$0xff] }
  0x90   : > { %v323_v12 = vmul.f32 -0.4, %v301_v8  ;;  %v335_v28 = vmul.f32 -0.5, %v301_v8  ;;  %v1125_v21 = vmul.f32 -0.25, %v301_v8  ;;  %v391_v25 = vld [vmem:[#allocation3 + $0x1] sm:$0xff] }
  0x91   : > { %v413_v29 = vmul.f32 -0.5, %v391_v25  ;;  %v425_v33 = vmul.f32 -1.0, %v391_v25  ;;  %v1155_v38 = vmul.f32 -0.2, %v391_v25 }
  0x92   : > { %v1090_v63 = vld [vmem:[#allocation2 + $0x2] sm:$0xff] }
  0x93   : > { %499 = vrot.lane.b32.xlu0 %v1090_v63, %s950_s23  ;;  %v1096_v6 = vld [vmem:[#allocation2] sm:$0xff]  ;;  %v485_v40 = vmul.f32 -1.0, %v1090_v63  ;;  %v507_v42 = vmul.f32 0.5, %v1090_v63 }
  0x94   : > { %v311_v7 = vmul.f32 -0.2, %v1096_v6  ;;  %v347_v0 = vmul.f32 0.2, %v1096_v6  ;;  %v367_v19 = vmul.f32 0.25, %v1096_v6  ;;  %v1127_v22 = vld [vmem:[#allocation2 + $0x1] sm:$0xff] }
  0x95   : > { %v401_v23 = vmul.f32 -0.5, %v1127_v22  ;;  %v437_v31 = vmul.f32 0.5, %v1127_v22  ;;  %v457_v35 = vmul.f32 0.4, %v1127_v22 }
  0x9a   : > { %v294_v1 = vpop.permute.xlu1 %293 }
  0x9b   : > { %298 = vst.msk [vmem:[#allocation3 + $0xa] sm:$0xff] %vm286_vm6, %v294_v1 }
  0xa0   : > { %v283_v2 = vpop.permute.xlu0 %282 }
  0xa1   : > { %288 = vst.msk [vmem:[#allocation2 + $0xa] sm:$0xff] %vm286_vm6, %v283_v2 }
  0xa2   : > { %v1094_v4 = vld [vmem:[#allocation3 + $0x3] sm:$0xff]  ;;  %v1106_v10 = vld [vmem:[#allocation3 + $0xb] sm:$0xff] }
  0xa3   : > { %557 = vrot.lane.b32.xlu0 %v1094_v4, %s951_s24  ;;  %v302_v16 = vld [vmem:[#allocation3 + $0x8] sm:$0xff]  ;;  %v543_v43 = vmul.f32 0.5, %v1094_v4  ;;  %v544_v48 = vmul.f32 0.5, %v1106_v10  ;;  %v1190_v3 = vmul.f32 0.2, %v1094_v4 }
  0xa4   : > { %v324_v17 = vmul.f32 -0.4, %v302_v16  ;;  %v336_v18 = vmul.f32 -0.5, %v302_v16  ;;  %v1136_v26 = vmul.f32 -0.25, %v302_v16  ;;  %v392_v5 = vld [vmem:[#allocation3 + $0x9] sm:$0xff] }
  0xa5   : > { %v414_v34 = vmul.f32 -0.5, %v392_v5  ;;  %v426_v37 = vmul.f32 -1.0, %v392_v5  ;;  %v1165_v41 = vmul.f32 -0.2, %v392_v5  ;;  %v609_v53 = vld [vmem:[#allocation3 + $0x4] sm:$0xff]  ;;  %v610_v30 = vld [vmem:[#allocation3 + $0xc] sm:$0xff] }
  0xa6   : > { %v631_v55 = vmul.f32 0.4, %v609_v53  ;;  %v1200_v56 = vmul.f32 0.2, %v1106_v10  ;;  %v643_v54 = vmul.f32 0.5, %v609_v53  ;;  %v644_v1 = vmul.f32 0.5, %v610_v30 }
  0xa7   : > { %315 = vrot.lane.b32.xlu0 %v311_v7, %s952_s25  ;;  %v632_v59 = vmul.f32 0.4, %v610_v30 }
  0xa8   : > { %v1101_v9 = vld [vmem:[#allocation2 + $0xa] sm:$0xff] }
  0xa9   : > { %501 = vrot.lane.b32.xlu1 %v1101_v9, %s950_s23  ;;  %v1109_v14 = vld [vmem:[#allocation2 + $0x8] sm:$0xff]  ;;  %v486_v44 = vmul.f32 -1.0, %v1101_v9  ;;  %v508_v46 = vmul.f32 0.5, %v1101_v9 }
  0xaa   : > { %v312_v15 = vmul.f32 -0.2, %v1109_v14  ;;  %v348_v20 = vmul.f32 0.2, %v1109_v14  ;;  %v368_v24 = vmul.f32 0.25, %v1109_v14  ;;  %v1139_v27 = vld [vmem:[#allocation2 + $0x9] sm:$0xff] }
  0xab   : > { %327 = vrot.lane.b32.xlu0 %v323_v12, %s952_s25  ;;  %v402_v32 = vmul.f32 -0.5, %v1139_v27  ;;  %v438_v36 = vmul.f32 0.5, %v1139_v27  ;;  %v458_v39 = vmul.f32 0.4, %v1139_v27  ;;  %v1172_v45 = vld [vmem:[#allocation2 + $0x3] sm:$0xff]  ;;  %v1182_v49 = vld [vmem:[#allocation2 + $0xb] sm:$0xff] }
  0xac   : > { %v531_v47 = vmul.f32 -0.5, %v1172_v45  ;;  %v565_v50 = vmul.f32 0.5, %v1172_v45  ;;  %v532_v51 = vmul.f32 -0.5, %v1182_v49  ;;  %v585_v11 = vmul.f32 0.4, %v1172_v45  ;;  %v1202_v57 = vld [vmem:[#allocation2 + $0x4] sm:$0xff] }
  0xad   : > { %559 = vrot.lane.b32.xlu1 %v1106_v10, %s951_s24  ;;  %v566_v52 = vmul.f32 0.5, %v1182_v49  ;;  %v619_v58 = vmul.f32 -0.2, %v1202_v57  ;;  %v586_v13 = vmul.f32 0.4, %v1182_v49  ;;  %v1212_v60 = vld [vmem:[#allocation2 + $0xc] sm:$0xff] }
  0xae   : > { %v655_v61 = vmul.f32 0.2, %v1202_v57  ;;  %v620_v62 = vmul.f32 -0.2, %v1212_v60  ;;  %v675_v4 = vmul.f32 0.25, %v1202_v57  ;;  %v1229_v10 = vmul.f32 0.25, %v609_v53 }
  0xaf   : > { %339 = vrot.lane.b32.xlu0 %v335_v28, %s951_s24  ;;  %v656_v7 = vmul.f32 0.2, %v1212_v60  ;;  %v676_v16 = vmul.f32 0.25, %v1212_v60 }
  0xb1   : > { %317 = vrot.lane.b32.xlu1 %v312_v15, %s952_s25 }
  0xb3   : > { %351 = vrot.lane.b32.xlu0 %v347_v0, %s950_s23 }
  0xb5   : > { %329 = vrot.lane.b32.xlu1 %v324_v17, %s952_s25 }
  0xb7   : > { %359 = vrot.lane.b32.xlu0 %v323_v12, %s950_s23  ;;  %v303_v12 = vmul.f32 -0.25, %v1096_v6  ;;  %v304_v6 = vmul.f32 -0.25, %v1109_v14 }
  0xb9   : > { %341 = vrot.lane.b32.xlu1 %v336_v18, %s951_s24 }
  0xbb   : > { %371 = vrot.lane.b32.xlu0 %v367_v19, %s953_s26  ;;  %v1241_v19 = vmul.f32 0.25, %v610_v30 }
  0xbd   : > { %353 = vrot.lane.b32.xlu1 %v348_v20, %s950_s23 }
  0xbf   : > { %381 = vrot.lane.b32.xlu0 %v1125_v21, %s953_s26 }
  0xc1   : > { %361 = vrot.lane.b32.xlu1 %v324_v17, %s950_s23 }
  0xc3   : > { %405 = vrot.lane.b32.xlu0 %v401_v23, %s952_s25 }
  0xc5   : > { %373 = vrot.lane.b32.xlu1 %v368_v24, %s953_s26 }
  0xc7   : > { %417 = vrot.lane.b32.xlu0 %v413_v29, %s952_s25 }
  0xc9   : > { %383 = vrot.lane.b32.xlu1 %v1136_v26, %s953_s26 }
  0xcb   : > { %441 = vrot.lane.b32.xlu0 %v437_v31, %s950_s23 }
  0xcd   : > { %407 = vrot.lane.b32.xlu1 %v402_v32, %s952_s25 }
  0xcf   : > { %429 = vrot.lane.b32.xlu0 %v425_v33, %s951_s24 }
  0xd1   : > { %419 = vrot.lane.b32.xlu1 %v414_v34, %s952_s25 }
  0xd3   : > { %461 = vrot.lane.b32.xlu0 %v457_v35, %s953_s26 }
  0xd5   : > { %443 = vrot.lane.b32.xlu1 %v438_v36, %s950_s23 }
  0xd7   : > { %449 = vrot.lane.b32.xlu0 %v413_v29, %s950_s23 }
  0xd9   : > { %431 = vrot.lane.b32.xlu1 %v426_v37, %s951_s24 }
  0xdb   : > { %471 = vrot.lane.b32.xlu0 %v1155_v38, %s953_s26 }
  0xdd   : > { %463 = vrot.lane.b32.xlu1 %v458_v39, %s953_s26 }
  0xdf   : > { %489 = vrot.lane.b32.xlu0 %v485_v40, %s952_s25 }
  0xe1   : > { %451 = vrot.lane.b32.xlu1 %v414_v34, %s950_s23 }
  0xe3   : > { %511 = vrot.lane.b32.xlu0 %v507_v42, %s953_s26 }
  0xe5   : > { %473 = vrot.lane.b32.xlu1 %v1165_v41, %s953_s26 }
  0xe7   : > { %547 = vrot.lane.b32.xlu0 %v543_v43, %s952_s25 }
  0xe9   : > { %491 = vrot.lane.b32.xlu1 %v486_v44, %s952_s25 }
  0xeb   : > { %535 = vrot.lane.b32.xlu0 %v531_v47, %s952_s25 }
  0xed   : > { %513 = vrot.lane.b32.xlu1 %v508_v46, %s953_s26 }
  0xef   : > { %577 = vrot.lane.b32.xlu0 %v543_v43, %s950_s23 }
  0xf1   : > { %549 = vrot.lane.b32.xlu1 %v544_v48, %s952_s25 }
  0xf3   : > { %569 = vrot.lane.b32.xlu0 %v565_v50, %s950_s23 }
  0xf5   : > { %537 = vrot.lane.b32.xlu1 %v532_v51, %s952_s25 }
  0xf7   : > { %599 = vrot.lane.b32.xlu0 %v1190_v3, %s953_s26 }
  0xf9   : > { %579 = vrot.lane.b32.xlu1 %v544_v48, %s950_s23 }
  0xfb   : > { %589 = vrot.lane.b32.xlu0 %v585_v11, %s953_s26  ;;  %v394_v11 = vmul.f32 -0.4, %v1139_v27 }
  0xfd   : > { %571 = vrot.lane.b32.xlu1 %v566_v52, %s950_s23 }
  0xff   : > { %635 = vrot.lane.b32.xlu0 %v631_v55, %s952_s25 }
 0x101   : > { %601 = vrot.lane.b32.xlu1 %v1200_v56, %s953_s26 }
 0x103   : > { %623 = vrot.lane.b32.xlu0 %v619_v58, %s952_s25 }
 0x105   : > { %591 = vrot.lane.b32.xlu1 %v586_v13, %s953_s26  ;;  %v1220_v2 = vpop.permute.xlu0 %499 }
 0x107   : > { %647 = vrot.lane.b32.xlu0 %v643_v54, %s951_s24 }
 0x109   : > { %637 = vrot.lane.b32.xlu1 %v632_v59, %s952_s25 }
 0x10b   : > { %659 = vrot.lane.b32.xlu0 %v655_v61, %s950_s23 }
 0x10d   : > { %625 = vrot.lane.b32.xlu1 %v620_v62, %s952_s25 }
 0x10f   : > { %667 = vrot.lane.b32.xlu0 %v631_v55, %s950_s23 }
 0x111   : > { %649 = vrot.lane.b32.xlu1 %v644_v1, %s951_s24  ;;  %v481_v1 = vmul.f32 -0.5, %v1090_v63  ;;  %v523_v63 = vmul.f32 -0.4, %v1172_v45 }
 0x113   : > { %679 = vrot.lane.b32.xlu0 %v675_v4, %s953_s26 }
 0x115   : > { %661 = vrot.lane.b32.xlu1 %v656_v7, %s950_s23  ;;  %v1227_v8 = vpop.permute.xlu0 %557 }
 0x117   : > { %689 = vrot.lane.b32.xlu0 %v1229_v10, %s953_s26 }
 0x119   : > { %669 = vrot.lane.b32.xlu1 %v632_v59, %s950_s23  ;;  %v316_v28 = vpop.permute.xlu0 %315 }
 0x11a   : > { %v321_v0 = vadd.f32 %v316_v28, %v303_v12 }
 0x11b   : > { %v1235_v15 = vpop.permute.xlu1 %501 }
 0x11d   : > { %681 = vrot.lane.b32.xlu1 %v676_v16, %s953_s26  ;;  %v328_v17 = vpop.permute.xlu0 %327 }
 0x11e   : > { %v333_v20 = vadd.f32 %v328_v17, %v1125_v21  ;;  %v393_v21 = vmul.f32 -0.4, %v1127_v22 }
 0x11f   : > { %v1239_v18 = vpop.permute.xlu1 %559 }
 0x121   : > { %691 = vrot.lane.b32.xlu1 %v1241_v19, %s953_s26  ;;  %v340_v23 = vpop.permute.xlu0 %339 }
 0x122   : > { %v345_v25 = vadd.f32 %v340_v23, %v333_v20  ;;  %v482_v20 = vmul.f32 -0.5, %v1101_v9 }
 0x123   : > { %v318_v24 = vpop.permute.xlu1 %317 }
 0x124   : > { %v322_v29 = vadd.f32 %v318_v24, %v304_v6 }
 0x125   : > { %v352_v31 = vpop.permute.xlu0 %351 }
 0x126   : > { %v357_v5 = vadd.f32 %v352_v31, %v321_v0 }
 0x127   : > { %v330_v32 = vpop.permute.xlu1 %329 }
 0x128   : > { %v334_v33 = vadd.f32 %v330_v32, %v1136_v26 }
 0x129   : > { %v360_v34 = vpop.permute.xlu0 %359 }
 0x12a   : > { %v365_v36 = vadd.f32 %v360_v34, %v345_v25 }
 0x12b   : > { %v342_v35 = vpop.permute.xlu1 %341 }
 0x12c   : > { %v346_v37 = vadd.f32 %v342_v35, %v334_v33 }
 0x12d   : > { %v372_v39 = vpop.permute.xlu0 %371 }
 0x12e   : > { %v377_v42 = vadd.f32 %v372_v39, %v357_v5 }
 0x12f   : > { %v354_v40 = vpop.permute.xlu1 %353 }
 0x130   : > { %v358_v43 = vadd.f32 %v354_v40, %v322_v29  ;;  %v395_v14 = vadd.f32 %v393_v21, %v377_v42  ;;  %v524_v21 = vmul.f32 -0.4, %v1182_v49  ;;  %v611_v49 = vmul.f32 -0.25, %v1202_v57 }
 0x131   : > { %v382_v44 = vpop.permute.xlu0 %381 }
 0x133   : > { %v362_v47 = vpop.permute.xlu1 %361 }
 0x134   : > { %v366_v46 = vadd.f32 %v362_v47, %v346_v37 }
 0x135   : > { %v406_v48 = vpop.permute.xlu0 %405 }
 0x136   : > { %v411_v30 = vadd.f32 %v406_v48, %v395_v14 }
 0x137   : > { %v374_v50 = vpop.permute.xlu1 %373 }
 0x138   : > { %v378_v51 = vadd.f32 %v374_v50, %v358_v43 }
 0x139   : > { %v418_v52 = vpop.permute.xlu0 %417 }
 0x13a   : > { %v396_v26 = vadd.f32 %v394_v11, %v378_v51 }
 0x13b   : > { %v384_v53 = vpop.permute.xlu1 %383 }
 0x13d   : > { %v442_v55 = vpop.permute.xlu0 %441 }
 0x13e   : > { %v447_v59 = vadd.f32 %v442_v55, %v411_v30 }
 0x13f   : > { %v408_v58 = vpop.permute.xlu1 %407 }
 0x140   : > { %v412_v28 = vadd.f32 %v408_v58, %v396_v26 }
 0x141   : > { %v430_v13 = vpop.permute.xlu0 %429 }
 0x143   : > { %v420_v54 = vpop.permute.xlu1 %419 }
 0x145   : > { %v462_v22 = vpop.permute.xlu0 %461 }
 0x146   : > { %v467_v62 = vadd.f32 %v462_v22, %v447_v59 }
 0x147   : > { %v444_v61 = vpop.permute.xlu1 %443 }
 0x148   : > { %v483_v4 = vadd.f32 %v481_v1, %v467_v62  ;;  %v448_v16 = vadd.f32 %v444_v61, %v412_v28 }
 0x149   : > { %v450_v7 = vpop.permute.xlu0 %449 }
 0x14b   : > { %v432_v12 = vpop.permute.xlu1 %431 }
 0x14d   : > { %v472_v27 = vpop.permute.xlu0 %471 }
 0x14f   : > { %v464_v0 = vpop.permute.xlu1 %463 }
 0x150   : > { %v468_v17 = vadd.f32 %v464_v0, %v448_v16 }
 0x151   : > { %v490_v6 = vpop.permute.xlu0 %489 }
 0x152   : > { %v484_v23 = vadd.f32 %v482_v20, %v468_v17  ;;  %v495_v25 = vadd.f32 %v490_v6, %v483_v4  ;;  %v612_v6 = vmul.f32 -0.25, %v1212_v60 }
 0x153   : > { %v452_v24 = vpop.permute.xlu1 %451 }
 0x154   : > { %v505_v29 = vadd.f32 %v1220_v2, %v495_v25  ;;  %v387_v2 = vadd.f32 %v382_v44, %v365_v36 }
 0x155   : > { %v512_v31 = vpop.permute.xlu0 %511 }
 0x156   : > { %v517_v5 = vadd.f32 %v512_v31, %v505_v29  ;;  %v399_v51 = vadd.f32 %v1155_v38, %v387_v2 }
 0x157   : > { %v474_v32 = vpop.permute.xlu1 %473 }
 0x158   : > { %v525_v33 = vadd.f32 %v523_v63, %v517_v5  ;;  %v423_v11 = vadd.f32 %v418_v52, %v399_v51 }
 0x159   : > { %v548_v34 = vpop.permute.xlu0 %547 }
 0x15a   : > { %v435_v58 = vadd.f32 %v430_v13, %v423_v11 }
 0x15b   : > { %v492_v35 = vpop.permute.xlu1 %491 }
 0x15c   : > { %v496_v37 = vadd.f32 %v492_v35, %v484_v23  ;;  %v455_v22 = vadd.f32 %v450_v7, %v435_v58 }
 0x15d   : > { %v536_v40 = vpop.permute.xlu0 %535 }
 0x15e   : > { %v506_v39 = vadd.f32 %v1235_v15, %v496_v37  ;;  %v541_v26 = vadd.f32 %v536_v40, %v525_v33  ;;  %v388_v15 = vadd.f32 %v384_v53, %v366_v46  ;;  %v477_v1 = vadd.f32 %v472_v27, %v455_v22 }
 0x15f   : > { %v514_v42 = vpop.permute.xlu1 %513 }
 0x160   : > { %v518_v9 = vadd.f32 %v514_v42, %v506_v39  ;;  %v400_v36 = vadd.f32 %v1165_v41, %v388_v15  ;;  %v529_v52 = vadd.f32 %v1190_v3, %v477_v1 }
 0x161   : > { %v578_v14 = vpop.permute.xlu0 %577 }
 0x162   : > { %v526_v43 = vadd.f32 %v524_v21, %v518_v9  ;;  %v424_v38 = vadd.f32 %v420_v54, %v400_v36  ;;  %v553_v46 = vadd.f32 %v548_v34, %v529_v52 }
 0x163   : > { %v550_v47 = vpop.permute.xlu1 %549 }
 0x164   : > { %v436_v0 = vadd.f32 %v432_v12, %v424_v38  ;;  %v563_v41 = vadd.f32 %v1227_v8, %v553_v46 }
 0x165   : > { %v570_v48 = vpop.permute.xlu0 %569 }
 0x166   : > { %v575_v30 = vadd.f32 %v570_v48, %v541_v26  ;;  %v456_v7 = vadd.f32 %v452_v24, %v436_v0  ;;  %v583_v29 = vadd.f32 %v578_v14, %v563_v41 }
 0x167   : > { %v538_v50 = vpop.permute.xlu1 %537 }
 0x168   : > { %v542_v16 = vadd.f32 %v538_v50, %v526_v43  ;;  %v478_v57 = vadd.f32 %v474_v32, %v456_v7 }
 0x169   : > { %v600_v45 = vpop.permute.xlu0 %599 }
 0x16a   : > { %v530_v54 = vadd.f32 %v1200_v56, %v478_v57  ;;  %v605_v3 = vadd.f32 %v600_v45, %v583_v29 }
 0x16b   : > { %v580_v55 = vpop.permute.xlu1 %579 }
 0x16c   : > { %v554_v5 = vadd.f32 %v550_v47, %v530_v54  ;;  %v617_v33 = vadd.f32 %v1229_v10, %v605_v3 }
 0x16d   : > { %v590_v59 = vpop.permute.xlu0 %589 }
 0x16e   : > { %v595_v62 = vadd.f32 %v590_v59, %v575_v30  ;;  %v564_v34 = vadd.f32 %v1239_v18, %v554_v5 }
 0x16f   : > { %v572_v61 = vpop.permute.xlu1 %571 }
 0x170   : > { %v613_v4 = vadd.f32 %v611_v49, %v595_v62  ;;  %v576_v13 = vadd.f32 %v572_v61, %v542_v16  ;;  %v584_v35 = vadd.f32 %v580_v55, %v564_v34 }
 0x171   : > { %v636_v44 = vpop.permute.xlu0 %635 }
 0x172   : > { %v641_v60 = vadd.f32 %v636_v44, %v617_v33 }
 0x173   : > { %v602_v28 = vpop.permute.xlu1 %601 }
 0x174   : > { %v606_v42 = vadd.f32 %v602_v28, %v584_v35 }
 0x175   : > { %v624_v17 = vpop.permute.xlu0 %623 }
 0x176   : > { %v629_v32 = vadd.f32 %v624_v17, %v613_v4  ;;  %v618_v47 = vadd.f32 %v1241_v19, %v606_v42 }
 0x177   : > { %v592_v53 = vpop.permute.xlu1 %591 }
 0x178   : > { %v596_v20 = vadd.f32 %v592_v53, %v576_v13 }
 0x179   : > { %v648_v23 = vpop.permute.xlu0 %647 }
 0x17a   : > { %v614_v27 = vadd.f32 %v612_v6, %v596_v20  ;;  %v653_v39 = vadd.f32 %v648_v23, %v641_v60 }
 0x17b   : > { %v638_v25 = vpop.permute.xlu1 %637 }
 0x17c   : > { %v642_v48 = vadd.f32 %v638_v25, %v618_v47 }
 0x17d   : > { %v660_v31 = vpop.permute.xlu0 %659 }
 0x17e   : > { %v665_v8 = vadd.f32 %v660_v31, %v629_v32 }
 0x17f   : > { %v626_v12 = vpop.permute.xlu1 %625 }
 0x180   : > { %v630_v50 = vadd.f32 %v626_v12, %v614_v27 }
 0x181   : > { %v668_v63 = vpop.permute.xlu0 %667 }
 0x182   : > { %v673_v9 = vadd.f32 %v668_v63, %v653_v39 }
 0x183   : > { %v650_v24 = vpop.permute.xlu1 %649 }
 0x184   : > { %v654_v45 = vadd.f32 %v650_v24, %v642_v48 }
 0x185   : > { %v680_v37 = vpop.permute.xlu0 %679 }
 0x186   : > { %v685_v56 = vadd.f32 %v680_v37, %v665_v8 }
 0x187   : > { %v662_v40 = vpop.permute.xlu1 %661 }
 0x188   : > { %v697_v2 = vmul.f32 %v685_v56, %v685_v56  ;;  %v666_v11 = vadd.f32 %v662_v40, %v630_v50 }
 0x189   : > { %v690_v21 = vpop.permute.xlu0 %689 }
 0x18a   : > { %v695_v14 = vadd.f32 %v690_v21, %v673_v9 }
 0x18b   : > { %v670_v43 = vpop.permute.xlu1 %669 }
 0x18c   : > { %v699_v10 = vmul.f32 %v695_v14, %v695_v14  ;;  %v674_v26 = vadd.f32 %v670_v43, %v654_v45 }
 0x18e   : > { %v701_v51 = vadd.f32 %v699_v10, %v697_v2 }
 0x18f   : > { %v682_v18 = vpop.permute.xlu1 %681 }
 0x190   : > { %v686_v55 = vadd.f32 %v682_v18, %v666_v11  ;;  %v789_v61 = vsel %vm727_vm3, %v701_v51, 0.0 }
 0x192   : > { %v698_v15 = vmul.f32 %v686_v55, %v686_v55 }
 0x193   : > { %v692_v58 = vpop.permute.xlu1 %691 }
 0x194   : > { %v696_v30 = vadd.f32 %v692_v58, %v674_v26 }
 0x196   : > { %v700_v59 = vmul.f32 %v696_v30, %v696_v30 }
 0x198   : > { %v702_v22 = vadd.f32 %v700_v59, %v698_v15 }
 0x19a   : > { %v790_v19 = vsel %vm727_vm3, %v702_v22, 0.0 }
 0x19b   : > { %v791_v62 = vadd.f32 %v790_v19, %v789_v61 }
 0x19d   : > { %v792_v49 = vrot.slane %v791_v62, 4 }
 0x19f   : > { %v793_v1 = vadd.f32 %v792_v49, %v791_v62 }
 0x1a1   : > { %v794_v4 = vrot.slane %v793_v1, 2 }
 0x1a3   : > { %v795_v36 = vadd.f32 %v794_v4, %v793_v1 }
 0x1a5   : > { %v796_v44 = vrot.slane %v795_v36, 1 }
 0x1a7   : > { %v797_v28 = vadd.f32 %v796_v44, %v795_v36 }
 0x1a9   : > { %798 = vst.msk [vmem:[%s1045_s22 + $0x6] sm:$0x1] %vm737_vm4, %v797_v28 }
 0x1aa PF: > { %s12_s9 = sadd.s32 1, %s946_s9  }
 0x1ab   : > { %p9_p4 = scmp.ge.s32.totalorder %s12_s9, 4  }
 0x1ad   :  { %11 = sbr.rel (!%p9_p4) target bundleno = 1 (0x1), region = 67 }

</bundles_post_ra>
